<compile_context>
chip_gen: v5e
topology: v5e:2x2
jax: 0.10.0
libtpu: 0.0.40
codegen_flags: <defaults>
</compile_context>

<pallas_src>
import math
import functools

import jax
import jax.numpy as jnp
from jax.experimental import pallas as pl
from jax.experimental.pallas import tpu as pltpu


# ----------------------------------------------------------------------------
# Kernel
# ----------------------------------------------------------------------------
def _isab_kernel(q0_ref, x_ref,
                 wk0_ref, bk0_ref, wv0_ref, bv0_ref, wo0_ref, bo0_ref,
                 wq1_ref, bq1_ref, wk1_ref, bk1_ref, wv1_ref, bv1_ref,
                 wo1_ref, bo1_ref,
                 o_ref,
                 *, num_heads, n_set, num_inds, dim_in, dim_out, tb,
                 compute_dtype):
    """One grid step processes `tb` batch elements (both MAB stages fused).

    q0_ref : (num_inds, dim_out)  precomputed fc_q0(I)  (batch-invariant)
    x_ref  : (tb, n_set, dim_in)  this block's set elements
    w*_ref : projection weights, pre-transposed so y = x @ w; the softmax
             scale 1/sqrt(dim_out) is already folded into wk0/bk0, wk1/bk1.
    b*_ref : (1, dim_out) biases
    o_ref  : (tb, n_set, dim_out) output
    """
    f32 = jnp.float32
    cd = compute_dtype
    ds = dim_out // num_heads

    Xf = x_ref[...].reshape(tb * n_set, dim_in).astype(cd)   # (tb*N, dim_in)

    def proj(rows, w_ref, b_ref):
        return (jnp.dot(rows, w_ref[...].astype(cd),
                        preferred_element_type=f32) + b_ref[...])

    def mha(Q, K, V):
        """Multi-head attention batched over tb; residual on projected Q.

        Q : (tb, nq, dim_out)  -- unscaled query projection (residual base)
        K : (tb, nk, dim_out)  -- scale already folded in
        V : (tb, nk, dim_out)
        returns (tb*nq, dim_out)
        """
        nq = Q.shape[1]
        outs = []
        for h in range(num_heads):              # static unroll, num_heads small
            sl = slice(h * ds, (h + 1) * ds)
            qh, kh, vh = Q[:, :, sl], K[:, :, sl], V[:, :, sl]
            # Contract the last axis directly (no explicit transpose).
            logits = jnp.einsum('bqd,bkd->bqk', qh.astype(cd), kh.astype(cd),
                                preferred_element_type=f32)
            m = jnp.max(logits, axis=-1, keepdims=True)
            p = jnp.exp(logits - m)
            inv_l = pl.reciprocal(jnp.sum(p, axis=-1, keepdims=True))
            av = jnp.einsum('bqk,bkd->bqd', p.astype(cd), vh.astype(cd),
                            preferred_element_type=f32)
            out_h = qh.astype(f32) + av * inv_l           # (tb, nq, ds)
            outs.append(out_h.reshape(tb * nq, ds))
        return jnp.concatenate(outs, axis=-1)             # (tb*nq, dim_out)

    # ---- MAB0: queries = inducing points, keys/values = X -------------------
    K0 = proj(Xf, wk0_ref, bk0_ref).reshape(tb, n_set, dim_out)
    V0 = proj(Xf, wv0_ref, bv0_ref).reshape(tb, n_set, dim_out)
    Q0 = jnp.broadcast_to(q0_ref[...][None], (tb, num_inds, dim_out))

    O0 = mha(Q0, K0, V0)                                   # (tb*num_inds, dim_out)
    Hf = O0 + jnp.maximum(proj(O0.astype(cd), wo0_ref, bo0_ref), 0.0)

    # ---- MAB1: queries = X, keys/values = H ---------------------------------
    Q1 = proj(Xf, wq1_ref, bq1_ref).reshape(tb, n_set, dim_out)
    Hc = Hf.astype(cd)
    K1 = proj(Hc, wk1_ref, bk1_ref).reshape(tb, num_inds, dim_out)
    V1 = proj(Hc, wv1_ref, bv1_ref).reshape(tb, num_inds, dim_out)

    O1 = mha(Q1, K1, V1)                                   # (tb*N, dim_out)
    out = O1 + jnp.maximum(proj(O1.astype(cd), wo1_ref, bo1_ref), 0.0)

    o_ref[...] = out.reshape(tb, n_set, dim_out).astype(o_ref.dtype)


# ----------------------------------------------------------------------------
# Wrapper
# ----------------------------------------------------------------------------
def _auto_batch_block(batch, n_set, max_rows=2048):
    """Largest batch block that divides the batch, leaves >= 2 grid steps
    (so both v7x TensorCores get work) and keeps the X tile modest."""
    best = 1
    for tb in range(1, batch + 1):
        if batch % tb == 0 and batch // tb >= 2 and tb * n_set <= max_rows:
            best = tb
    return best


def isab_forward(X, params, *, num_heads, batch_block=None,
                 compute_dtype=jnp.float32):
    """X: (B, N, dim_in) float32.  params: dict with I and m0_/m1_ weights."""
    B, N, dim_in = X.shape
    num_inds, dim_out = params["I"].shape[1], params["I"].shape[2]
    assert dim_out % num_heads == 0

    tb = batch_block if batch_block is not None else _auto_batch_block(B, N)
    assert B % tb == 0
    grid = (B // tb,)

    scale = 1.0 / math.sqrt(dim_out)
    hi = jax.lax.Precision.HIGHEST

    # Hoisted, batch-invariant: Q0 = fc_q0(I).
    q0 = (jnp.dot(params["I"][0], params["m0_wq"].T, precision=hi)
          + params["m0_bq"]).astype(jnp.float32)

    # Pre-transpose Linear weights (kernel computes x @ W) and fold the
    # 1/sqrt(dim_V) softmax scale into the K projections.
    wk0 = params["m0_wk"].T * scale
    bk0 = (params["m0_bk"] * scale).reshape(1, dim_out)
    wv0 = params["m0_wv"].T
    bv0 = params["m0_bv"].reshape(1, dim_out)
    wo0 = params["m0_wo"].T
    bo0 = params["m0_bo"].reshape(1, dim_out)
    wq1 = params["m1_wq"].T
    bq1 = params["m1_bq"].reshape(1, dim_out)
    wk1 = params["m1_wk"].T * scale
    bk1 = (params["m1_bk"] * scale).reshape(1, dim_out)
    wv1 = params["m1_wv"].T
    bv1 = params["m1_bv"].reshape(1, dim_out)
    wo1 = params["m1_wo"].T
    bo1 = params["m1_bo"].reshape(1, dim_out)

    kernel = functools.partial(
        _isab_kernel, num_heads=num_heads, n_set=N, num_inds=num_inds,
        dim_in=dim_in, dim_out=dim_out, tb=tb, compute_dtype=compute_dtype)

    def _const(shape):
        nd = len(shape)
        return pl.BlockSpec(shape, lambda b, _n=nd: (0,) * _n)

    in_specs = [
        _const((num_inds, dim_out)),                          # q0 (precomputed)
        pl.BlockSpec((tb, N, dim_in), lambda b: (b, 0, 0)),   # X
        _const((dim_in, dim_out)),  _const((1, dim_out)),     # wk0, bk0 (scaled)
        _const((dim_in, dim_out)),  _const((1, dim_out)),     # wv0, bv0
        _const((dim_out, dim_out)), _const((1, dim_out)),     # wo0, bo0
        _const((dim_in, dim_out)),  _const((1, dim_out)),     # wq1, bq1
        _const((dim_out, dim_out)), _const((1, dim_out)),     # wk1, bk1 (scaled)
        _const((dim_out, dim_out)), _const((1, dim_out)),     # wv1, bv1
        _const((dim_out, dim_out)), _const((1, dim_out)),     # wo1, bo1
    ]

    # Advisory cost estimate so XLA can overlap this call with neighbours.
    flops = int(B * (
        2 * N * dim_in * dim_out * 3                  # K0, V0, Q1 projections
        + 2 * num_inds * dim_out * dim_out * 3        # fc_o0, K1, V1
        + 2 * N * dim_out * dim_out                   # fc_o1
        + 8 * N * num_inds * dim_out))                # both attention stages
    transcendentals = int(B * 2 * num_heads * N * num_inds)
    param_bytes = sum(int(v.size) * 4 for k, v in params.items() if k != "I")
    bytes_accessed = int((B * N * dim_in + B * N * dim_out
                          + num_inds * dim_out) * 4 + param_bytes)

    return pl.pallas_call(
        kernel,
        out_shape=jax.ShapeDtypeStruct((B, N, dim_out), X.dtype),
        grid_spec=pltpu.PrefetchScalarGridSpec(
            num_scalar_prefetch=0,
            grid=grid,
            in_specs=in_specs,
            out_specs=pl.BlockSpec((tb, N, dim_out), lambda b: (b, 0, 0)),
        ),
        compiler_params=pltpu.CompilerParams(
            dimension_semantics=("parallel",)),
        cost_estimate=pl.CostEstimate(
            flops=flops, transcendentals=transcendentals,
            bytes_accessed=bytes_accessed),
    )(q0, X, wk0, bk0, wv0, bv0, wo0, bo0,
      wq1, bq1, wk1, bk1, wv1, bv1, wo1, bo1)


# ----------------------------------------------------------------------------
# Pure-JAX reference (mirrors the PyTorch MAB/ISAB exactly)
# ----------------------------------------------------------------------------
def _mm(a, b):
    return jnp.matmul(a, b, precision=jax.lax.Precision.HIGHEST)


def _mab_reference(Qin, Kin, w, num_heads):
    wq, bq, wk, bk, wv, bv, wo, bo = w
    dim_V = wq.shape[0]
    Q = _mm(Qin, wq.T) + bq
    K = _mm(Kin, wk.T) + bk
    V = _mm(Kin, wv.T) + bv
    ds = dim_V // num_heads
    cat = lambda T: jnp.concatenate(
        [T[..., h * ds:(h + 1) * ds] for h in range(num_heads)], axis=0)
    Q_, K_, V_ = cat(Q), cat(K), cat(V)
    A = jax.nn.softmax(_mm(Q_, jnp.swapaxes(K_, 1, 2)) / math.sqrt(dim_V), axis=2)
    O = jnp.concatenate(jnp.split(Q_ + _mm(A, V_), num_heads, axis=0), axis=2)
    return O + jax.nn.relu(_mm(O, wo.T) + bo)


def isab_reference(X, params, *, num_heads):
    B = X.shape[0]
    I = jnp.broadcast_to(params["I"], (B,) + params["I"].shape[1:])
    names = ("wq", "bq", "wk", "bk", "wv", "bv", "wo", "bo")
    m0 = tuple(params["m0_" + n] for n in names)
    m1 = tuple(params["m1_" + n] for n in names)
    H = _mab_reference(I, X, m0, num_heads)
    return _mab_reference(X, H, m1, num_heads)


# ----------------------------------------------------------------------------
# Parameter init (test harness only)
# ----------------------------------------------------------------------------
def init_params(key, dim_in, dim_out, num_inds):
    keys = jax.random.split(key, 17)
    it = iter(keys)

    def lin(kw, kb, fan_in, fan_out):
        bound = math.sqrt(6.0 / (fan_in + fan_out))
        w = jax.random.uniform(kw, (fan_out, fan_in), jnp.float32, -bound, bound)
        b = jax.random.normal(kb, (fan_out,), jnp.float32) * 0.02
        return w, b

    p = {}
    bound = math.sqrt(6.0 / (num_inds + dim_out))
    p["I"] = jax.random.uniform(next(it), (1, num_inds, dim_out),
                                jnp.float32, -bound, bound)
    # mab0 = MAB(dim_out, dim_in, dim_out): fc_q dim_out->dim_out,
    # fc_k/fc_v dim_in->dim_out, fc_o dim_out->dim_out.
    for name, fi in (("wq", dim_out), ("wk", dim_in), ("wv", dim_in), ("wo", dim_out)):
        w, b = lin(next(it), next(it), fi, dim_out)
        p["m0_" + name] = w
        p["m0_b" + name[1]] = b
    # mab1 = MAB(dim_in, dim_out, dim_out): fc_q dim_in->dim_out, rest dim_out.
    for name, fi in (("wq", dim_in), ("wk", dim_out), ("wv", dim_out), ("wo", dim_out)):
        w, b = lin(next(it), next(it), fi, dim_out)
        p["m1_" + name] = w
        p["m1_b" + name[1]] = b
    return p


if __name__ == "__main__":
    B, N, dim_in, dim_out = 4, 16, 16, 32
    num_heads, num_inds = 4, 8

    key = jax.random.PRNGKey(0)
    kx, kp = jax.random.split(key)
    X = jax.random.normal(kx, (B, N, dim_in), jnp.float32)
    params = init_params(kp, dim_in, dim_out, num_inds)

    out = isab_forward(X, params, num_heads=num_heads)
    out = jax.block_until_ready(out)

    ref = isab_reference(X, params, num_heads=num_heads)
    assert out.shape == (B, N, dim_out)
    max_err = jnp.max(jnp.abs(out - ref))
    assert jnp.allclose(out, ref, atol=2e-3, rtol=2e-3), \
        f"mismatch vs reference, max abs err = {max_err}"

    print("KERNEL_OK")
</pallas_src>

<mosaic_0001>
module attributes {stable_mosaic.version = 11 : i64} {
  func.func @_isab_kernel(%arg0: i32, %arg1: memref<8x32xf32, #tpu.memory_space<vmem>>, %arg2: memref<2x16x16xf32, #tpu.memory_space<vmem>>, %arg3: memref<16x32xf32, #tpu.memory_space<vmem>>, %arg4: memref<1x32xf32, #tpu.memory_space<vmem>>, %arg5: memref<16x32xf32, #tpu.memory_space<vmem>>, %arg6: memref<1x32xf32, #tpu.memory_space<vmem>>, %arg7: memref<32x32xf32, #tpu.memory_space<vmem>>, %arg8: memref<1x32xf32, #tpu.memory_space<vmem>>, %arg9: memref<16x32xf32, #tpu.memory_space<vmem>>, %arg10: memref<1x32xf32, #tpu.memory_space<vmem>>, %arg11: memref<32x32xf32, #tpu.memory_space<vmem>>, %arg12: memref<1x32xf32, #tpu.memory_space<vmem>>, %arg13: memref<32x32xf32, #tpu.memory_space<vmem>>, %arg14: memref<1x32xf32, #tpu.memory_space<vmem>>, %arg15: memref<32x32xf32, #tpu.memory_space<vmem>>, %arg16: memref<1x32xf32, #tpu.memory_space<vmem>>, %arg17: memref<2x16x32xf32, #tpu.memory_space<vmem>>) attributes {dimension_semantics = [#tpu.dimension_semantics<parallel>], iteration_bounds = array<i64: 2>, scalar_prefetch = 0 : i64, scratch_operands = 0 : i64, tpu.core_type = #tpu.core_type<tc>, window_params = [{pipeline_mode = #tpu.pipeline_mode<synchronous>, transform_indices = @transform_0, window_bounds = array<i64: 8, 32>}, {transform_indices = @transform_1, window_bounds = array<i64: 2, 16, 16>}, {pipeline_mode = #tpu.pipeline_mode<synchronous>, transform_indices = @transform_2, window_bounds = array<i64: 16, 32>}, {pipeline_mode = #tpu.pipeline_mode<synchronous>, transform_indices = @transform_3, window_bounds = array<i64: 1, 32>}, {pipeline_mode = #tpu.pipeline_mode<synchronous>, transform_indices = @transform_4, window_bounds = array<i64: 16, 32>}, {pipeline_mode = #tpu.pipeline_mode<synchronous>, transform_indices = @transform_5, window_bounds = array<i64: 1, 32>}, {pipeline_mode = #tpu.pipeline_mode<synchronous>, transform_indices = @transform_6, window_bounds = array<i64: 32, 32>}, {pipeline_mode = #tpu.pipeline_mode<synchronous>, transform_indices = @transform_7, window_bounds = array<i64: 1, 32>}, {pipeline_mode = #tpu.pipeline_mode<synchronous>, transform_indices = @transform_8, window_bounds = array<i64: 16, 32>}, {pipeline_mode = #tpu.pipeline_mode<synchronous>, transform_indices = @transform_9, window_bounds = array<i64: 1, 32>}, {pipeline_mode = #tpu.pipeline_mode<synchronous>, transform_indices = @transform_10, window_bounds = array<i64: 32, 32>}, {pipeline_mode = #tpu.pipeline_mode<synchronous>, transform_indices = @transform_11, window_bounds = array<i64: 1, 32>}, {pipeline_mode = #tpu.pipeline_mode<synchronous>, transform_indices = @transform_12, window_bounds = array<i64: 32, 32>}, {pipeline_mode = #tpu.pipeline_mode<synchronous>, transform_indices = @transform_13, window_bounds = array<i64: 1, 32>}, {pipeline_mode = #tpu.pipeline_mode<synchronous>, transform_indices = @transform_14, window_bounds = array<i64: 32, 32>}, {pipeline_mode = #tpu.pipeline_mode<synchronous>, transform_indices = @transform_15, window_bounds = array<i64: 1, 32>}, {transform_indices = @transform_16, window_bounds = array<i64: 2, 16, 32>}]} {
    %c0 = arith.constant 0 : index
    %c0_0 = arith.constant 0 : index
    %c0_1 = arith.constant 0 : index
    %0 = vector.load %arg2[%c0, %c0_0, %c0_1] : memref<2x16x16xf32, #tpu.memory_space<vmem>>, vector<2x16x16xf32>
    %1 = vector.shape_cast %0 : vector<2x16x16xf32> to vector<32x16xf32>
    %c0_2 = arith.constant 0 : index
    %c0_3 = arith.constant 0 : index
    %2 = vector.load %arg3[%c0_2, %c0_3] : memref<16x32xf32, #tpu.memory_space<vmem>>, vector<16x32xf32>
    %cst = arith.constant dense<0.000000e+00> : vector<32x32xf32>
    %3 = tpu.matmul %1, %2, %cst {dimension_numbers = #tpu.dot_dimension_numbers<[1], [0], [0], [1], [0, 0, 1, 1], [], []>} : vector<32x16xf32>, vector<16x32xf32>, vector<32x32xf32> -> vector<32x32xf32>
    %c0_4 = arith.constant 0 : index
    %c0_5 = arith.constant 0 : index
    %4 = vector.load %arg4[%c0_4, %c0_5] : memref<1x32xf32, #tpu.memory_space<vmem>>, vector<1x32xf32>
    %5 = vector.broadcast %4 : vector<1x32xf32> to vector<32x32xf32>
    %6 = arith.addf %3, %5 : vector<32x32xf32>
    %7 = vector.shape_cast %6 : vector<32x32xf32> to vector<2x16x32xf32>
    %c0_6 = arith.constant 0 : index
    %c0_7 = arith.constant 0 : index
    %8 = vector.load %arg5[%c0_6, %c0_7] : memref<16x32xf32, #tpu.memory_space<vmem>>, vector<16x32xf32>
    %cst_8 = arith.constant dense<0.000000e+00> : vector<32x32xf32>
    %9 = tpu.matmul %1, %8, %cst_8 {dimension_numbers = #tpu.dot_dimension_numbers<[1], [0], [0], [1], [0, 0, 1, 1], [], []>} : vector<32x16xf32>, vector<16x32xf32>, vector<32x32xf32> -> vector<32x32xf32>
    %c0_9 = arith.constant 0 : index
    %c0_10 = arith.constant 0 : index
    %10 = vector.load %arg6[%c0_9, %c0_10] : memref<1x32xf32, #tpu.memory_space<vmem>>, vector<1x32xf32>
    %11 = vector.broadcast %10 : vector<1x32xf32> to vector<32x32xf32>
    %12 = arith.addf %9, %11 : vector<32x32xf32>
    %13 = vector.shape_cast %12 : vector<32x32xf32> to vector<2x16x32xf32>
    %c0_11 = arith.constant 0 : index
    %c0_12 = arith.constant 0 : index
    %14 = vector.load %arg1[%c0_11, %c0_12] : memref<8x32xf32, #tpu.memory_space<vmem>>, vector<8x32xf32>
    %15 = vector.shape_cast %14 : vector<8x32xf32> to vector<1x8x32xf32>
    %16 = vector.shape_cast %15 : vector<1x8x32xf32> to vector<1x8x32xf32>
    %17 = vector.broadcast %16 : vector<1x8x32xf32> to vector<2x8x32xf32>
    %18 = vector.extract_strided_slice %17 {offsets = [0, 0, 0], sizes = [2, 8, 8], strides = [1, 1, 1]} : vector<2x8x32xf32> to vector<2x8x8xf32>
    %19 = vector.extract_strided_slice %7 {offsets = [0, 0, 0], sizes = [2, 16, 8], strides = [1, 1, 1]} : vector<2x16x32xf32> to vector<2x16x8xf32>
    %20 = vector.extract_strided_slice %13 {offsets = [0, 0, 0], sizes = [2, 16, 8], strides = [1, 1, 1]} : vector<2x16x32xf32> to vector<2x16x8xf32>
    "tpu.trace_start"() <{level = 10 : i32, message = "bqd,bkd->bqk"}> : () -> ()
    %cst_13 = arith.constant dense<0.000000e+00> : vector<2x8x16xf32>
    %21 = tpu.matmul %18, %19, %cst_13 {dimension_numbers = #tpu.dot_dimension_numbers<[2], [2], [1], [1], [0, 0, 0, 1, 1, 1], [0], [0]>} : vector<2x8x8xf32>, vector<2x16x8xf32>, vector<2x8x16xf32> -> vector<2x8x16xf32>
    "tpu.trace_stop"() : () -> ()
    %cst_14 = arith.constant dense<0xFF800000> : vector<2x8xf32>
    %22 = vector.multi_reduction <maximumf>, %21, %cst_14 [2] : vector<2x8x16xf32> to vector<2x8xf32>
    %23 = vector.shape_cast %22 : vector<2x8xf32> to vector<2x8x1xf32>
    %24 = vector.broadcast %23 : vector<2x8x1xf32> to vector<2x8x16xf32>
    %25 = arith.subf %21, %24 : vector<2x8x16xf32>
    %26 = math.exp %25 : vector<2x8x16xf32>
    %cst_15 = arith.constant dense<0.000000e+00> : vector<2x8xf32>
    %27 = vector.multi_reduction <add>, %26, %cst_15 [2] : vector<2x8x16xf32> to vector<2x8xf32>
    %28 = vector.shape_cast %27 : vector<2x8xf32> to vector<2x8x1xf32>
    %29 = tpu.reciprocal %28 : vector<2x8x1xf32> -> vector<2x8x1xf32>
    "tpu.trace_start"() <{level = 10 : i32, message = "bqk,bkd->bqd"}> : () -> ()
    %cst_16 = arith.constant dense<0.000000e+00> : vector<2x8x8xf32>
    %30 = tpu.matmul %26, %20, %cst_16 {dimension_numbers = #tpu.dot_dimension_numbers<[2], [1], [1], [2], [0, 0, 0, 1, 1, 2], [0], [0]>} : vector<2x8x16xf32>, vector<2x16x8xf32>, vector<2x8x8xf32> -> vector<2x8x8xf32>
    "tpu.trace_stop"() : () -> ()
    %31 = vector.broadcast %29 : vector<2x8x1xf32> to vector<2x8x8xf32>
    %32 = arith.mulf %30, %31 : vector<2x8x8xf32>
    %33 = arith.addf %18, %32 : vector<2x8x8xf32>
    %34 = vector.shape_cast %33 : vector<2x8x8xf32> to vector<16x8xf32>
    %35 = vector.extract_strided_slice %17 {offsets = [0, 0, 8], sizes = [2, 8, 8], strides = [1, 1, 1]} : vector<2x8x32xf32> to vector<2x8x8xf32>
    %36 = vector.extract_strided_slice %7 {offsets = [0, 0, 8], sizes = [2, 16, 8], strides = [1, 1, 1]} : vector<2x16x32xf32> to vector<2x16x8xf32>
    %37 = vector.extract_strided_slice %13 {offsets = [0, 0, 8], sizes = [2, 16, 8], strides = [1, 1, 1]} : vector<2x16x32xf32> to vector<2x16x8xf32>
    "tpu.trace_start"() <{level = 10 : i32, message = "bqd,bkd->bqk"}> : () -> ()
    %cst_17 = arith.constant dense<0.000000e+00> : vector<2x8x16xf32>
    %38 = tpu.matmul %35, %36, %cst_17 {dimension_numbers = #tpu.dot_dimension_numbers<[2], [2], [1], [1], [0, 0, 0, 1, 1, 1], [0], [0]>} : vector<2x8x8xf32>, vector<2x16x8xf32>, vector<2x8x16xf32> -> vector<2x8x16xf32>
    "tpu.trace_stop"() : () -> ()
    %cst_18 = arith.constant dense<0xFF800000> : vector<2x8xf32>
    %39 = vector.multi_reduction <maximumf>, %38, %cst_18 [2] : vector<2x8x16xf32> to vector<2x8xf32>
    %40 = vector.shape_cast %39 : vector<2x8xf32> to vector<2x8x1xf32>
    %41 = vector.broadcast %40 : vector<2x8x1xf32> to vector<2x8x16xf32>
    %42 = arith.subf %38, %41 : vector<2x8x16xf32>
    %43 = math.exp %42 : vector<2x8x16xf32>
    %cst_19 = arith.constant dense<0.000000e+00> : vector<2x8xf32>
    %44 = vector.multi_reduction <add>, %43, %cst_19 [2] : vector<2x8x16xf32> to vector<2x8xf32>
    %45 = vector.shape_cast %44 : vector<2x8xf32> to vector<2x8x1xf32>
    %46 = tpu.reciprocal %45 : vector<2x8x1xf32> -> vector<2x8x1xf32>
    "tpu.trace_start"() <{level = 10 : i32, message = "bqk,bkd->bqd"}> : () -> ()
    %cst_20 = arith.constant dense<0.000000e+00> : vector<2x8x8xf32>
    %47 = tpu.matmul %43, %37, %cst_20 {dimension_numbers = #tpu.dot_dimension_numbers<[2], [1], [1], [2], [0, 0, 0, 1, 1, 2], [0], [0]>} : vector<2x8x16xf32>, vector<2x16x8xf32>, vector<2x8x8xf32> -> vector<2x8x8xf32>
    "tpu.trace_stop"() : () -> ()
    %48 = vector.broadcast %46 : vector<2x8x1xf32> to vector<2x8x8xf32>
    %49 = arith.mulf %47, %48 : vector<2x8x8xf32>
    %50 = arith.addf %35, %49 : vector<2x8x8xf32>
    %51 = vector.shape_cast %50 : vector<2x8x8xf32> to vector<16x8xf32>
    %52 = vector.extract_strided_slice %17 {offsets = [0, 0, 16], sizes = [2, 8, 8], strides = [1, 1, 1]} : vector<2x8x32xf32> to vector<2x8x8xf32>
    %53 = vector.extract_strided_slice %7 {offsets = [0, 0, 16], sizes = [2, 16, 8], strides = [1, 1, 1]} : vector<2x16x32xf32> to vector<2x16x8xf32>
    %54 = vector.extract_strided_slice %13 {offsets = [0, 0, 16], sizes = [2, 16, 8], strides = [1, 1, 1]} : vector<2x16x32xf32> to vector<2x16x8xf32>
    "tpu.trace_start"() <{level = 10 : i32, message = "bqd,bkd->bqk"}> : () -> ()
    %cst_21 = arith.constant dense<0.000000e+00> : vector<2x8x16xf32>
    %55 = tpu.matmul %52, %53, %cst_21 {dimension_numbers = #tpu.dot_dimension_numbers<[2], [2], [1], [1], [0, 0, 0, 1, 1, 1], [0], [0]>} : vector<2x8x8xf32>, vector<2x16x8xf32>, vector<2x8x16xf32> -> vector<2x8x16xf32>
    "tpu.trace_stop"() : () -> ()
    %cst_22 = arith.constant dense<0xFF800000> : vector<2x8xf32>
    %56 = vector.multi_reduction <maximumf>, %55, %cst_22 [2] : vector<2x8x16xf32> to vector<2x8xf32>
    %57 = vector.shape_cast %56 : vector<2x8xf32> to vector<2x8x1xf32>
    %58 = vector.broadcast %57 : vector<2x8x1xf32> to vector<2x8x16xf32>
    %59 = arith.subf %55, %58 : vector<2x8x16xf32>
    %60 = math.exp %59 : vector<2x8x16xf32>
    %cst_23 = arith.constant dense<0.000000e+00> : vector<2x8xf32>
    %61 = vector.multi_reduction <add>, %60, %cst_23 [2] : vector<2x8x16xf32> to vector<2x8xf32>
    %62 = vector.shape_cast %61 : vector<2x8xf32> to vector<2x8x1xf32>
    %63 = tpu.reciprocal %62 : vector<2x8x1xf32> -> vector<2x8x1xf32>
    "tpu.trace_start"() <{level = 10 : i32, message = "bqk,bkd->bqd"}> : () -> ()
    %cst_24 = arith.constant dense<0.000000e+00> : vector<2x8x8xf32>
    %64 = tpu.matmul %60, %54, %cst_24 {dimension_numbers = #tpu.dot_dimension_numbers<[2], [1], [1], [2], [0, 0, 0, 1, 1, 2], [0], [0]>} : vector<2x8x16xf32>, vector<2x16x8xf32>, vector<2x8x8xf32> -> vector<2x8x8xf32>
    "tpu.trace_stop"() : () -> ()
    %65 = vector.broadcast %63 : vector<2x8x1xf32> to vector<2x8x8xf32>
    %66 = arith.mulf %64, %65 : vector<2x8x8xf32>
    %67 = arith.addf %52, %66 : vector<2x8x8xf32>
    %68 = vector.shape_cast %67 : vector<2x8x8xf32> to vector<16x8xf32>
    %69 = vector.extract_strided_slice %17 {offsets = [0, 0, 24], sizes = [2, 8, 8], strides = [1, 1, 1]} : vector<2x8x32xf32> to vector<2x8x8xf32>
    %70 = vector.extract_strided_slice %7 {offsets = [0, 0, 24], sizes = [2, 16, 8], strides = [1, 1, 1]} : vector<2x16x32xf32> to vector<2x16x8xf32>
    %71 = vector.extract_strided_slice %13 {offsets = [0, 0, 24], sizes = [2, 16, 8], strides = [1, 1, 1]} : vector<2x16x32xf32> to vector<2x16x8xf32>
    "tpu.trace_start"() <{level = 10 : i32, message = "bqd,bkd->bqk"}> : () -> ()
    %cst_25 = arith.constant dense<0.000000e+00> : vector<2x8x16xf32>
    %72 = tpu.matmul %69, %70, %cst_25 {dimension_numbers = #tpu.dot_dimension_numbers<[2], [2], [1], [1], [0, 0, 0, 1, 1, 1], [0], [0]>} : vector<2x8x8xf32>, vector<2x16x8xf32>, vector<2x8x16xf32> -> vector<2x8x16xf32>
    "tpu.trace_stop"() : () -> ()
    %cst_26 = arith.constant dense<0xFF800000> : vector<2x8xf32>
    %73 = vector.multi_reduction <maximumf>, %72, %cst_26 [2] : vector<2x8x16xf32> to vector<2x8xf32>
    %74 = vector.shape_cast %73 : vector<2x8xf32> to vector<2x8x1xf32>
    %75 = vector.broadcast %74 : vector<2x8x1xf32> to vector<2x8x16xf32>
    %76 = arith.subf %72, %75 : vector<2x8x16xf32>
    %77 = math.exp %76 : vector<2x8x16xf32>
    %cst_27 = arith.constant dense<0.000000e+00> : vector<2x8xf32>
    %78 = vector.multi_reduction <add>, %77, %cst_27 [2] : vector<2x8x16xf32> to vector<2x8xf32>
    %79 = vector.shape_cast %78 : vector<2x8xf32> to vector<2x8x1xf32>
    %80 = tpu.reciprocal %79 : vector<2x8x1xf32> -> vector<2x8x1xf32>
    "tpu.trace_start"() <{level = 10 : i32, message = "bqk,bkd->bqd"}> : () -> ()
    %cst_28 = arith.constant dense<0.000000e+00> : vector<2x8x8xf32>
    %81 = tpu.matmul %77, %71, %cst_28 {dimension_numbers = #tpu.dot_dimension_numbers<[2], [1], [1], [2], [0, 0, 0, 1, 1, 2], [0], [0]>} : vector<2x8x16xf32>, vector<2x16x8xf32>, vector<2x8x8xf32> -> vector<2x8x8xf32>
    "tpu.trace_stop"() : () -> ()
    %82 = vector.broadcast %80 : vector<2x8x1xf32> to vector<2x8x8xf32>
    %83 = arith.mulf %81, %82 : vector<2x8x8xf32>
    %84 = arith.addf %69, %83 : vector<2x8x8xf32>
    %85 = vector.shape_cast %84 : vector<2x8x8xf32> to vector<16x8xf32>
    %86 = tpu.concatenate %34, %51, %68, %85 in 1 : vector<16x8xf32>, vector<16x8xf32>, vector<16x8xf32>, vector<16x8xf32> -> vector<16x32xf32>
    %c0_29 = arith.constant 0 : index
    %c0_30 = arith.constant 0 : index
    %87 = vector.load %arg7[%c0_29, %c0_30] : memref<32x32xf32, #tpu.memory_space<vmem>>, vector<32x32xf32>
    %cst_31 = arith.constant dense<0.000000e+00> : vector<16x32xf32>
    %88 = tpu.matmul %86, %87, %cst_31 {dimension_numbers = #tpu.dot_dimension_numbers<[1], [0], [0], [1], [0, 0, 1, 1], [], []>} : vector<16x32xf32>, vector<32x32xf32>, vector<16x32xf32> -> vector<16x32xf32>
    %c0_32 = arith.constant 0 : index
    %c0_33 = arith.constant 0 : index
    %89 = vector.load %arg8[%c0_32, %c0_33] : memref<1x32xf32, #tpu.memory_space<vmem>>, vector<1x32xf32>
    %90 = vector.broadcast %89 : vector<1x32xf32> to vector<16x32xf32>
    %91 = arith.addf %88, %90 : vector<16x32xf32>
    %cst_34 = arith.constant 0.000000e+00 : f32
    %92 = vector.broadcast %cst_34 : f32 to vector<16x32xf32>
    %93 = arith.maximumf %91, %92 : vector<16x32xf32>
    %94 = arith.addf %86, %93 : vector<16x32xf32>
    %c0_35 = arith.constant 0 : index
    %c0_36 = arith.constant 0 : index
    %95 = vector.load %arg9[%c0_35, %c0_36] : memref<16x32xf32, #tpu.memory_space<vmem>>, vector<16x32xf32>
    %cst_37 = arith.constant dense<0.000000e+00> : vector<32x32xf32>
    %96 = tpu.matmul %1, %95, %cst_37 {dimension_numbers = #tpu.dot_dimension_numbers<[1], [0], [0], [1], [0, 0, 1, 1], [], []>} : vector<32x16xf32>, vector<16x32xf32>, vector<32x32xf32> -> vector<32x32xf32>
    %c0_38 = arith.constant 0 : index
    %c0_39 = arith.constant 0 : index
    %97 = vector.load %arg10[%c0_38, %c0_39] : memref<1x32xf32, #tpu.memory_space<vmem>>, vector<1x32xf32>
    %98 = vector.broadcast %97 : vector<1x32xf32> to vector<32x32xf32>
    %99 = arith.addf %96, %98 : vector<32x32xf32>
    %100 = vector.shape_cast %99 : vector<32x32xf32> to vector<2x16x32xf32>
    %c0_40 = arith.constant 0 : index
    %c0_41 = arith.constant 0 : index
    %101 = vector.load %arg11[%c0_40, %c0_41] : memref<32x32xf32, #tpu.memory_space<vmem>>, vector<32x32xf32>
    %cst_42 = arith.constant dense<0.000000e+00> : vector<16x32xf32>
    %102 = tpu.matmul %94, %101, %cst_42 {dimension_numbers = #tpu.dot_dimension_numbers<[1], [0], [0], [1], [0, 0, 1, 1], [], []>} : vector<16x32xf32>, vector<32x32xf32>, vector<16x32xf32> -> vector<16x32xf32>
    %c0_43 = arith.constant 0 : index
    %c0_44 = arith.constant 0 : index
    %103 = vector.load %arg12[%c0_43, %c0_44] : memref<1x32xf32, #tpu.memory_space<vmem>>, vector<1x32xf32>
    %104 = vector.broadcast %103 : vector<1x32xf32> to vector<16x32xf32>
    %105 = arith.addf %102, %104 : vector<16x32xf32>
    %106 = vector.shape_cast %105 : vector<16x32xf32> to vector<2x8x32xf32>
    %c0_45 = arith.constant 0 : index
    %c0_46 = arith.constant 0 : index
    %107 = vector.load %arg13[%c0_45, %c0_46] : memref<32x32xf32, #tpu.memory_space<vmem>>, vector<32x32xf32>
    %cst_47 = arith.constant dense<0.000000e+00> : vector<16x32xf32>
    %108 = tpu.matmul %94, %107, %cst_47 {dimension_numbers = #tpu.dot_dimension_numbers<[1], [0], [0], [1], [0, 0, 1, 1], [], []>} : vector<16x32xf32>, vector<32x32xf32>, vector<16x32xf32> -> vector<16x32xf32>
    %c0_48 = arith.constant 0 : index
    %c0_49 = arith.constant 0 : index
    %109 = vector.load %arg14[%c0_48, %c0_49] : memref<1x32xf32, #tpu.memory_space<vmem>>, vector<1x32xf32>
    %110 = vector.broadcast %109 : vector<1x32xf32> to vector<16x32xf32>
    %111 = arith.addf %108, %110 : vector<16x32xf32>
    %112 = vector.shape_cast %111 : vector<16x32xf32> to vector<2x8x32xf32>
    %113 = vector.extract_strided_slice %100 {offsets = [0, 0, 0], sizes = [2, 16, 8], strides = [1, 1, 1]} : vector<2x16x32xf32> to vector<2x16x8xf32>
    %114 = vector.extract_strided_slice %106 {offsets = [0, 0, 0], sizes = [2, 8, 8], strides = [1, 1, 1]} : vector<2x8x32xf32> to vector<2x8x8xf32>
    %115 = vector.extract_strided_slice %112 {offsets = [0, 0, 0], sizes = [2, 8, 8], strides = [1, 1, 1]} : vector<2x8x32xf32> to vector<2x8x8xf32>
    "tpu.trace_start"() <{level = 10 : i32, message = "bqd,bkd->bqk"}> : () -> ()
    %cst_50 = arith.constant dense<0.000000e+00> : vector<2x16x8xf32>
    %116 = tpu.matmul %113, %114, %cst_50 {dimension_numbers = #tpu.dot_dimension_numbers<[2], [2], [1], [1], [0, 0, 0, 1, 1, 1], [0], [0]>} : vector<2x16x8xf32>, vector<2x8x8xf32>, vector<2x16x8xf32> -> vector<2x16x8xf32>
    "tpu.trace_stop"() : () -> ()
    %cst_51 = arith.constant dense<0xFF800000> : vector<2x16xf32>
    %117 = vector.multi_reduction <maximumf>, %116, %cst_51 [2] : vector<2x16x8xf32> to vector<2x16xf32>
    %118 = vector.shape_cast %117 : vector<2x16xf32> to vector<2x16x1xf32>
    %119 = vector.broadcast %118 : vector<2x16x1xf32> to vector<2x16x8xf32>
    %120 = arith.subf %116, %119 : vector<2x16x8xf32>
    %121 = math.exp %120 : vector<2x16x8xf32>
    %cst_52 = arith.constant dense<0.000000e+00> : vector<2x16xf32>
    %122 = vector.multi_reduction <add>, %121, %cst_52 [2] : vector<2x16x8xf32> to vector<2x16xf32>
    %123 = vector.shape_cast %122 : vector<2x16xf32> to vector<2x16x1xf32>
    %124 = tpu.reciprocal %123 : vector<2x16x1xf32> -> vector<2x16x1xf32>
    "tpu.trace_start"() <{level = 10 : i32, message = "bqk,bkd->bqd"}> : () -> ()
    %cst_53 = arith.constant dense<0.000000e+00> : vector<2x16x8xf32>
    %125 = tpu.matmul %121, %115, %cst_53 {dimension_numbers = #tpu.dot_dimension_numbers<[2], [1], [1], [2], [0, 0, 0, 1, 1, 2], [0], [0]>} : vector<2x16x8xf32>, vector<2x8x8xf32>, vector<2x16x8xf32> -> vector<2x16x8xf32>
    "tpu.trace_stop"() : () -> ()
    %126 = vector.broadcast %124 : vector<2x16x1xf32> to vector<2x16x8xf32>
    %127 = arith.mulf %125, %126 : vector<2x16x8xf32>
    %128 = arith.addf %113, %127 : vector<2x16x8xf32>
    %129 = vector.shape_cast %128 : vector<2x16x8xf32> to vector<32x8xf32>
    %130 = vector.extract_strided_slice %100 {offsets = [0, 0, 8], sizes = [2, 16, 8], strides = [1, 1, 1]} : vector<2x16x32xf32> to vector<2x16x8xf32>
    %131 = vector.extract_strided_slice %106 {offsets = [0, 0, 8], sizes = [2, 8, 8], strides = [1, 1, 1]} : vector<2x8x32xf32> to vector<2x8x8xf32>
    %132 = vector.extract_strided_slice %112 {offsets = [0, 0, 8], sizes = [2, 8, 8], strides = [1, 1, 1]} : vector<2x8x32xf32> to vector<2x8x8xf32>
    "tpu.trace_start"() <{level = 10 : i32, message = "bqd,bkd->bqk"}> : () -> ()
    %cst_54 = arith.constant dense<0.000000e+00> : vector<2x16x8xf32>
    %133 = tpu.matmul %130, %131, %cst_54 {dimension_numbers = #tpu.dot_dimension_numbers<[2], [2], [1], [1], [0, 0, 0, 1, 1, 1], [0], [0]>} : vector<2x16x8xf32>, vector<2x8x8xf32>, vector<2x16x8xf32> -> vector<2x16x8xf32>
    "tpu.trace_stop"() : () -> ()
    %cst_55 = arith.constant dense<0xFF800000> : vector<2x16xf32>
    %134 = vector.multi_reduction <maximumf>, %133, %cst_55 [2] : vector<2x16x8xf32> to vector<2x16xf32>
    %135 = vector.shape_cast %134 : vector<2x16xf32> to vector<2x16x1xf32>
    %136 = vector.broadcast %135 : vector<2x16x1xf32> to vector<2x16x8xf32>
    %137 = arith.subf %133, %136 : vector<2x16x8xf32>
    %138 = math.exp %137 : vector<2x16x8xf32>
    %cst_56 = arith.constant dense<0.000000e+00> : vector<2x16xf32>
    %139 = vector.multi_reduction <add>, %138, %cst_56 [2] : vector<2x16x8xf32> to vector<2x16xf32>
    %140 = vector.shape_cast %139 : vector<2x16xf32> to vector<2x16x1xf32>
    %141 = tpu.reciprocal %140 : vector<2x16x1xf32> -> vector<2x16x1xf32>
    "tpu.trace_start"() <{level = 10 : i32, message = "bqk,bkd->bqd"}> : () -> ()
    %cst_57 = arith.constant dense<0.000000e+00> : vector<2x16x8xf32>
    %142 = tpu.matmul %138, %132, %cst_57 {dimension_numbers = #tpu.dot_dimension_numbers<[2], [1], [1], [2], [0, 0, 0, 1, 1, 2], [0], [0]>} : vector<2x16x8xf32>, vector<2x8x8xf32>, vector<2x16x8xf32> -> vector<2x16x8xf32>
    "tpu.trace_stop"() : () -> ()
    %143 = vector.broadcast %141 : vector<2x16x1xf32> to vector<2x16x8xf32>
    %144 = arith.mulf %142, %143 : vector<2x16x8xf32>
    %145 = arith.addf %130, %144 : vector<2x16x8xf32>
    %146 = vector.shape_cast %145 : vector<2x16x8xf32> to vector<32x8xf32>
    %147 = vector.extract_strided_slice %100 {offsets = [0, 0, 16], sizes = [2, 16, 8], strides = [1, 1, 1]} : vector<2x16x32xf32> to vector<2x16x8xf32>
    %148 = vector.extract_strided_slice %106 {offsets = [0, 0, 16], sizes = [2, 8, 8], strides = [1, 1, 1]} : vector<2x8x32xf32> to vector<2x8x8xf32>
    %149 = vector.extract_strided_slice %112 {offsets = [0, 0, 16], sizes = [2, 8, 8], strides = [1, 1, 1]} : vector<2x8x32xf32> to vector<2x8x8xf32>
    "tpu.trace_start"() <{level = 10 : i32, message = "bqd,bkd->bqk"}> : () -> ()
    %cst_58 = arith.constant dense<0.000000e+00> : vector<2x16x8xf32>
    %150 = tpu.matmul %147, %148, %cst_58 {dimension_numbers = #tpu.dot_dimension_numbers<[2], [2], [1], [1], [0, 0, 0, 1, 1, 1], [0], [0]>} : vector<2x16x8xf32>, vector<2x8x8xf32>, vector<2x16x8xf32> -> vector<2x16x8xf32>
    "tpu.trace_stop"() : () -> ()
    %cst_59 = arith.constant dense<0xFF800000> : vector<2x16xf32>
    %151 = vector.multi_reduction <maximumf>, %150, %cst_59 [2] : vector<2x16x8xf32> to vector<2x16xf32>
    %152 = vector.shape_cast %151 : vector<2x16xf32> to vector<2x16x1xf32>
    %153 = vector.broadcast %152 : vector<2x16x1xf32> to vector<2x16x8xf32>
    %154 = arith.subf %150, %153 : vector<2x16x8xf32>
    %155 = math.exp %154 : vector<2x16x8xf32>
    %cst_60 = arith.constant dense<0.000000e+00> : vector<2x16xf32>
    %156 = vector.multi_reduction <add>, %155, %cst_60 [2] : vector<2x16x8xf32> to vector<2x16xf32>
    %157 = vector.shape_cast %156 : vector<2x16xf32> to vector<2x16x1xf32>
    %158 = tpu.reciprocal %157 : vector<2x16x1xf32> -> vector<2x16x1xf32>
    "tpu.trace_start"() <{level = 10 : i32, message = "bqk,bkd->bqd"}> : () -> ()
    %cst_61 = arith.constant dense<0.000000e+00> : vector<2x16x8xf32>
    %159 = tpu.matmul %155, %149, %cst_61 {dimension_numbers = #tpu.dot_dimension_numbers<[2], [1], [1], [2], [0, 0, 0, 1, 1, 2], [0], [0]>} : vector<2x16x8xf32>, vector<2x8x8xf32>, vector<2x16x8xf32> -> vector<2x16x8xf32>
    "tpu.trace_stop"() : () -> ()
    %160 = vector.broadcast %158 : vector<2x16x1xf32> to vector<2x16x8xf32>
    %161 = arith.mulf %159, %160 : vector<2x16x8xf32>
    %162 = arith.addf %147, %161 : vector<2x16x8xf32>
    %163 = vector.shape_cast %162 : vector<2x16x8xf32> to vector<32x8xf32>
    %164 = vector.extract_strided_slice %100 {offsets = [0, 0, 24], sizes = [2, 16, 8], strides = [1, 1, 1]} : vector<2x16x32xf32> to vector<2x16x8xf32>
    %165 = vector.extract_strided_slice %106 {offsets = [0, 0, 24], sizes = [2, 8, 8], strides = [1, 1, 1]} : vector<2x8x32xf32> to vector<2x8x8xf32>
    %166 = vector.extract_strided_slice %112 {offsets = [0, 0, 24], sizes = [2, 8, 8], strides = [1, 1, 1]} : vector<2x8x32xf32> to vector<2x8x8xf32>
    "tpu.trace_start"() <{level = 10 : i32, message = "bqd,bkd->bqk"}> : () -> ()
    %cst_62 = arith.constant dense<0.000000e+00> : vector<2x16x8xf32>
    %167 = tpu.matmul %164, %165, %cst_62 {dimension_numbers = #tpu.dot_dimension_numbers<[2], [2], [1], [1], [0, 0, 0, 1, 1, 1], [0], [0]>} : vector<2x16x8xf32>, vector<2x8x8xf32>, vector<2x16x8xf32> -> vector<2x16x8xf32>
    "tpu.trace_stop"() : () -> ()
    %cst_63 = arith.constant dense<0xFF800000> : vector<2x16xf32>
    %168 = vector.multi_reduction <maximumf>, %167, %cst_63 [2] : vector<2x16x8xf32> to vector<2x16xf32>
    %169 = vector.shape_cast %168 : vector<2x16xf32> to vector<2x16x1xf32>
    %170 = vector.broadcast %169 : vector<2x16x1xf32> to vector<2x16x8xf32>
    %171 = arith.subf %167, %170 : vector<2x16x8xf32>
    %172 = math.exp %171 : vector<2x16x8xf32>
    %cst_64 = arith.constant dense<0.000000e+00> : vector<2x16xf32>
    %173 = vector.multi_reduction <add>, %172, %cst_64 [2] : vector<2x16x8xf32> to vector<2x16xf32>
    %174 = vector.shape_cast %173 : vector<2x16xf32> to vector<2x16x1xf32>
    %175 = tpu.reciprocal %174 : vector<2x16x1xf32> -> vector<2x16x1xf32>
    "tpu.trace_start"() <{level = 10 : i32, message = "bqk,bkd->bqd"}> : () -> ()
    %cst_65 = arith.constant dense<0.000000e+00> : vector<2x16x8xf32>
    %176 = tpu.matmul %172, %166, %cst_65 {dimension_numbers = #tpu.dot_dimension_numbers<[2], [1], [1], [2], [0, 0, 0, 1, 1, 2], [0], [0]>} : vector<2x16x8xf32>, vector<2x8x8xf32>, vector<2x16x8xf32> -> vector<2x16x8xf32>
    "tpu.trace_stop"() : () -> ()
    %177 = vector.broadcast %175 : vector<2x16x1xf32> to vector<2x16x8xf32>
    %178 = arith.mulf %176, %177 : vector<2x16x8xf32>
    %179 = arith.addf %164, %178 : vector<2x16x8xf32>
    %180 = vector.shape_cast %179 : vector<2x16x8xf32> to vector<32x8xf32>
    %181 = tpu.concatenate %129, %146, %163, %180 in 1 : vector<32x8xf32>, vector<32x8xf32>, vector<32x8xf32>, vector<32x8xf32> -> vector<32x32xf32>
    %c0_66 = arith.constant 0 : index
    %c0_67 = arith.constant 0 : index
    %182 = vector.load %arg15[%c0_66, %c0_67] : memref<32x32xf32, #tpu.memory_space<vmem>>, vector<32x32xf32>
    %cst_68 = arith.constant dense<0.000000e+00> : vector<32x32xf32>
    %183 = tpu.matmul %181, %182, %cst_68 {dimension_numbers = #tpu.dot_dimension_numbers<[1], [0], [0], [1], [0, 0, 1, 1], [], []>} : vector<32x32xf32>, vector<32x32xf32>, vector<32x32xf32> -> vector<32x32xf32>
    %c0_69 = arith.constant 0 : index
    %c0_70 = arith.constant 0 : index
    %184 = vector.load %arg16[%c0_69, %c0_70] : memref<1x32xf32, #tpu.memory_space<vmem>>, vector<1x32xf32>
    %185 = vector.broadcast %184 : vector<1x32xf32> to vector<32x32xf32>
    %186 = arith.addf %183, %185 : vector<32x32xf32>
    %cst_71 = arith.constant 0.000000e+00 : f32
    %187 = vector.broadcast %cst_71 : f32 to vector<32x32xf32>
    %188 = arith.maximumf %186, %187 : vector<32x32xf32>
    %189 = arith.addf %181, %188 : vector<32x32xf32>
    %190 = vector.shape_cast %189 : vector<32x32xf32> to vector<2x16x32xf32>
    %c0_72 = arith.constant 0 : index
    %c0_73 = arith.constant 0 : index
    %c0_74 = arith.constant 0 : index
    %191 = vector.load %arg17[%c0_72, %c0_73, %c0_74] : memref<2x16x32xf32, #tpu.memory_space<vmem>>, vector<2x16x32xf32>
    tpu.vector_store %arg17[%c0_72, %c0_73, %c0_74], %190 {strides = array<i32>} : memref<2x16x32xf32, #tpu.memory_space<vmem>>, vector<2x16x32xf32>,
    return
  }
  func.func @transform_0(%arg0: i32) -> (i32, i32) {
    %c0_i32 = arith.constant 0 : i32
    %c0_i32_0 = arith.constant 0 : i32
    %c0_i32_1 = arith.constant 0 : i32
    return %c0_i32, %c0_i32_0 : i32, i32
  }
  func.func @transform_1(%arg0: i32) -> (i32, i32, i32) {
    %c0_i32 = arith.constant 0 : i32
    %c0_i32_0 = arith.constant 0 : i32
    %c0_i32_1 = arith.constant 0 : i32
    return %arg0, %c0_i32, %c0_i32_0 : i32, i32, i32
  }
  func.func @transform_2(%arg0: i32) -> (i32, i32) {
    %c0_i32 = arith.constant 0 : i32
    %c0_i32_0 = arith.constant 0 : i32
    %c0_i32_1 = arith.constant 0 : i32
    return %c0_i32, %c0_i32_0 : i32, i32
  }
  func.func @transform_3(%arg0: i32) -> (i32, i32) {
    %c0_i32 = arith.constant 0 : i32
    %c0_i32_0 = arith.constant 0 : i32
    %c0_i32_1 = arith.constant 0 : i32
    return %c0_i32, %c0_i32_0 : i32, i32
  }
  func.func @transform_4(%arg0: i32) -> (i32, i32) {
    %c0_i32 = arith.constant 0 : i32
    %c0_i32_0 = arith.constant 0 : i32
    %c0_i32_1 = arith.constant 0 : i32
    return %c0_i32, %c0_i32_0 : i32, i32
  }
  func.func @transform_5(%arg0: i32) -> (i32, i32) {
    %c0_i32 = arith.constant 0 : i32
    %c0_i32_0 = arith.constant 0 : i32
    %c0_i32_1 = arith.constant 0 : i32
    return %c0_i32, %c0_i32_0 : i32, i32
  }
  func.func @transform_6(%arg0: i32) -> (i32, i32) {
    %c0_i32 = arith.constant 0 : i32
    %c0_i32_0 = arith.constant 0 : i32
    %c0_i32_1 = arith.constant 0 : i32
    return %c0_i32, %c0_i32_0 : i32, i32
  }
  func.func @transform_7(%arg0: i32) -> (i32, i32) {
    %c0_i32 = arith.constant 0 : i32
    %c0_i32_0 = arith.constant 0 : i32
    %c0_i32_1 = arith.constant 0 : i32
    return %c0_i32, %c0_i32_0 : i32, i32
  }
  func.func @transform_8(%arg0: i32) -> (i32, i32) {
    %c0_i32 = arith.constant 0 : i32
    %c0_i32_0 = arith.constant 0 : i32
    %c0_i32_1 = arith.constant 0 : i32
    return %c0_i32, %c0_i32_0 : i32, i32
  }
  func.func @transform_9(%arg0: i32) -> (i32, i32) {
    %c0_i32 = arith.constant 0 : i32
    %c0_i32_0 = arith.constant 0 : i32
    %c0_i32_1 = arith.constant 0 : i32
    return %c0_i32, %c0_i32_0 : i32, i32
  }
  func.func @transform_10(%arg0: i32) -> (i32, i32) {
    %c0_i32 = arith.constant 0 : i32
    %c0_i32_0 = arith.constant 0 : i32
    %c0_i32_1 = arith.constant 0 : i32
    return %c0_i32, %c0_i32_0 : i32, i32
  }
  func.func @transform_11(%arg0: i32) -> (i32, i32) {
    %c0_i32 = arith.constant 0 : i32
    %c0_i32_0 = arith.constant 0 : i32
    %c0_i32_1 = arith.constant 0 : i32
    return %c0_i32, %c0_i32_0 : i32, i32
  }
  func.func @transform_12(%arg0: i32) -> (i32, i32) {
    %c0_i32 = arith.constant 0 : i32
    %c0_i32_0 = arith.constant 0 : i32
    %c0_i32_1 = arith.constant 0 : i32
    return %c0_i32, %c0_i32_0 : i32, i32
  }
  func.func @transform_13(%arg0: i32) -> (i32, i32) {
    %c0_i32 = arith.constant 0 : i32
    %c0_i32_0 = arith.constant 0 : i32
    %c0_i32_1 = arith.constant 0 : i32
    return %c0_i32, %c0_i32_0 : i32, i32
  }
  func.func @transform_14(%arg0: i32) -> (i32, i32) {
    %c0_i32 = arith.constant 0 : i32
    %c0_i32_0 = arith.constant 0 : i32
    %c0_i32_1 = arith.constant 0 : i32
    return %c0_i32, %c0_i32_0 : i32, i32
  }
  func.func @transform_15(%arg0: i32) -> (i32, i32) {
    %c0_i32 = arith.constant 0 : i32
    %c0_i32_0 = arith.constant 0 : i32
    %c0_i32_1 = arith.constant 0 : i32
    return %c0_i32, %c0_i32_0 : i32, i32
  }
  func.func @transform_16(%arg0: i32) -> (i32, i32, i32) {
    %c0_i32 = arith.constant 0 : i32
    %c0_i32_0 = arith.constant 0 : i32
    %c0_i32_1 = arith.constant 0 : i32
    return %arg0, %c0_i32, %c0_i32_0 : i32, i32, i32
  }
}

</mosaic_0001>

<bundles_post_ra>
// kernel: tpu_custom_call.1
= control target key start
LH: loop header
LB: loop body
LE: loop exit
PB: predicated region body
PF: predicated region fallthrough
CT: control target
= control target key end

     0   :  { %s4466_s0 = inlined_call_operand.hbm [shape: f32[8,32], index: 0, kind: input, shape index: {}]   ;;  %s4467_s1 = inlined_call_operand.hbm [shape: f32[4,16,16], index: 1, kind: input, shape index: {}]   ;;  %s4468_s2 = inlined_call_operand.hbm [shape: f32[16,32], index: 2, kind: input, shape index: {}]   ;;  %s4469_s3 = inlined_call_operand.vmem [shape: f32[1,32], index: 3, kind: input, shape index: {}]   ;;  %s4470_s4 = inlined_call_operand.hbm [shape: f32[16,32], index: 4, kind: input, shape index: {}]   ;;  %s4471_s5 = inlined_call_operand.vmem [shape: f32[1,32], index: 5, kind: input, shape index: {}]   ;;  %s4472_s6 = inlined_call_operand.hbm [shape: f32[32,32], index: 6, kind: input, shape index: {}]   ;;  %s4473_s7 = inlined_call_operand.vmem [shape: f32[1,32], index: 7, kind: input, shape index: {}]   ;;  %s4474_s8 = inlined_call_operand.hbm [shape: f32[16,32], index: 8, kind: input, shape index: {}]   ;;  %s4475_s9 = inlined_call_operand.vmem [shape: f32[1,32], index: 9, kind: input, shape index: {}]   ;;  %s4476_s10 = inlined_call_operand.hbm [shape: f32[32,32], index: 10, kind: input, shape index: {}]   ;;  %s4477_s11 = inlined_call_operand.vmem [shape: f32[1,32], index: 11, kind: input, shape index: {}]   ;;  %s4478_s12 = inlined_call_operand.hbm [shape: f32[32,32], index: 12, kind: input, shape index: {}]   ;;  %s4479_s13 = inlined_call_operand.vmem [shape: f32[1,32], index: 13, kind: input, shape index: {}]   ;;  %s4480_s14 = inlined_call_operand.hbm [shape: f32[32,32], index: 14, kind: input, shape index: {}]   ;;  %s4481_s15 = inlined_call_operand.vmem [shape: f32[1,32], index: 15, kind: input, shape index: {}]   ;;  %s4482_s16 = inlined_call_operand.hbm [shape: f32[4,16,32], index: 16, kind: output, shape index: {}]  }
   0x1   :  { %4486 = sst [smem:[#allocation25_spill]] %s4466_s0 }
   0x2   :  { %4487 = sst [smem:[#allocation26_spill]] %s4468_s2 }
   0x3   :  { %4488 = sst [smem:[#allocation27_spill]] %s4470_s4 }
   0x4   :  { %4489 = sst [smem:[#allocation28_spill]] %s4472_s6 }
   0x5   :  { %4490 = sst [smem:[#allocation29_spill]] %s4474_s8 }
   0x6   :  { %4491 = sst [smem:[#allocation30_spill]] %s4476_s10 }
   0x7   :  { %4492 = sst [smem:[#allocation31_spill]] %s4477_s11 }
   0x8   :  { %4493 = sst [smem:[#allocation32_spill]] %s4478_s12 }
   0x9   :  { %4494 = sst [smem:[#allocation33_spill]] %s4479_s13 }
   0xa   :  { %4495 = sst [smem:[#allocation34_spill]] %s4481_s15 }
   0xb   :  { %4496 = sst [smem:[#allocation35_spill]] %s4482_s16 }
   0xc   :  { %21 = vsyncpa [#allocation3], 0 }
   0xd   :  { %22 = vsyncpa [#allocation6], 0 }
   0xe   :  { %24 = vsyncpa [#allocation6 + $0x1], 0 }
   0xf   :  { %25 = vsyncpa [#allocation9], 0 }
  0x10   :  { %26 = vsyncpa [#allocation12], 0 }
  0x11   :  { %27 = vsyncpa [#allocation15], 0 }
  0x12   :  { %28 = vsyncpa [#allocation4], 0 }
  0x13   :  { %30 = vsyncpa [#allocation4 + $0x1], 0  ;;  %s3680_s21 = smov 0   ;;  %s3682_s22 = smov 0  }
  0x14   :  { %s3684_s23 = smov 0   ;;  %s3686_s24 = smov 0  }
  0x15 LB: > { %s4497_s2 = sld [smem:[#allocation26_spill]]  ;;  %s3704_s28 = sadd.s32 4294967295, %s3576_s24   ;;  %s3576_s24 = sphi %s3686_s24, %s4525_s24   ;;  %s3572_s23 = sphi %s3684_s23, %s4524_s23   ;;  %s3568_s22 = sphi %s3682_s22, %s4523_s22   ;;  %s3564_s21 = sphi %s3680_s21, %s4522_s21  }
  0x16   : > { %p2815_p0 = scmp.ge.s32.totalorder %s3576_s24, 1  ;;  %p78_p1 = scmp.eq.s32.totalorder %s3704_s28, 0 }
  0x17   : > { %p408_p2 = scmp.lt.s32.totalorder %s3576_s24, 3  ;;  %s3578_s30 = smov [#allocation7]  }
  0x18   : > { %s433_s0 = sshll.u32 %s3578_s30, 4  ;;  %s4499_s4 = sld [smem:[#allocation27_spill]]  ;;  %s434_s0 = int_to_ptr.vmem [resolvable:$true] %s433_s0 }
  0x19   : > { %p3709_p3 = pnand %p2815_p0, %p408_p2  ;;  %s4501_s8 = sld [smem:[#allocation29_spill]] }
  0x1a   : > { %s4484_s15 = smov 128   ;;  %s4485_s13 = smov 8  }
  0x1b   : > { %s431_s27 = sshll.u32 %s4497_s2, 4  ;;  %p2982_p4 = pneg %p3709_p3  ;;  %s432_s27 = int_to_ptr.hbm [resolvable:$true] %s431_s27 }
  0x1c   : > { %s3579_s2 = smov [#allocation8]   ;;  %s4502_s12 = sld [smem:[#allocation32_spill]] }
  0x1d   : > { %p3721_p6 = pnand %p2982_p4, %p78_p1  ;;  %s450_s16 = sshll.u32 %s3579_s2, 4  ;;  %s451_s16 = int_to_ptr.vmem [resolvable:$true] %s450_s16 }
  0x1e   : > { %s448_s19 = sshll.u32 %s4499_s4, 4  ;;  %s3582_s2 = smov [#allocation11]   ;;  %s449_s19 = int_to_ptr.hbm [resolvable:$true] %s448_s19 }
  0x1f   : > { %s482_s30 = sshll.u32 %s4501_s8, 4  ;;  %s484_s26 = sshll.u32 %s3582_s2, 4  ;;  %s483_s30 = int_to_ptr.hbm [resolvable:$true] %s482_s30  ;;  %s485_s26 = int_to_ptr.vmem [resolvable:$true] %s484_s26 }
  0x20   : > { %2988 = dma.hbm_to_vmem [thread:$0]  (!%p3721_p6), %s432_s27, 256, %s434_s0, [#allocation6], %s4484_s15, %s4484_s15, %s4485_s13  }
  0x21   : > { %2991 = dma.hbm_to_vmem [thread:$0]  (!%p3721_p6), %s449_s19, 256, %s451_s16, [#allocation9], %s4484_s15, %s4484_s15, %s4485_s13  }
  0x22   : > { %s516_s25 = sshll.u32 %s4502_s12, 4  ;;  %s3583_s27 = smov [#allocation14]   ;;  %s517_s25 = int_to_ptr.hbm [resolvable:$true] %s516_s25 }
  0x23   : > { %2997 = dma.hbm_to_vmem [thread:$0]  (!%p3721_p6), %s483_s30, 256, %s485_s26, [#allocation12], %s4484_s15, %s4484_s15, %s4485_s13  }
  0x24   : > { %s518_s0 = sshll.u32 %s3583_s27, 4  ;;  %s4503_s11 = sld [smem:[#allocation25_spill]]  ;;  %s519_s0 = int_to_ptr.vmem [resolvable:$true] %s518_s0 }
  0x25   : > { %3003 = dma.hbm_to_vmem [thread:$0]  (!%p3721_p6), %s517_s25, 512, %s519_s0, [#allocation15], %s4484_s15, %s4484_s15, %s4485_s13  }
  0x26   : > { %s4504_s6 = sld [smem:[#allocation28_spill]]  ;;  %s3584_s2 = smov [#allocation2]  }
  0x27   : > { %s422_s30 = sshll.u32 %s3584_s2, 4  ;;  %s3585_s4 = smov [#allocation10]   ;;  %s423_s30 = int_to_ptr.vmem [resolvable:$true] %s422_s30 }
  0x28   : > { %s467_s8 = sshll.u32 %s3585_s4, 4  ;;  %s4505_s10 = sld [smem:[#allocation30_spill]]  ;;  %s468_s8 = int_to_ptr.vmem [resolvable:$true] %s467_s8 }
  0x29   : > { %s3586_s19 = smov [#allocation13]   ;;  %s3782_s4 = sadd.s32 1, %s3576_s24  }
  0x2a   : > { %s420_s16 = sshll.u32 %s4503_s11, 4  ;;  %s501_s17 = sshll.u32 %s3586_s19, 4  ;;  %s421_s16 = int_to_ptr.hbm [resolvable:$true] %s420_s16  ;;  %s502_s17 = int_to_ptr.vmem [resolvable:$true] %s501_s17 }
  0x2b   : > { %2985 = dma.hbm_to_vmem [thread:$0]  (!%p3721_p6), %s421_s16, 128, %s423_s30, [#allocation3]  }
  0x2c   : > { %s465_s18 = sshll.u32 %s4504_s6, 4  ;;  %s533_s16 = sshll.u32 %s4480_s14, 4  ;;  %s466_s18 = int_to_ptr.hbm [resolvable:$true] %s465_s18  ;;  %s534_s16 = int_to_ptr.hbm [resolvable:$true] %s533_s16 }
  0x2d   : > { %2994 = dma.hbm_to_vmem [thread:$0]  (!%p3721_p6), %s466_s18, 512, %s468_s8, [#allocation9], %s4484_s15, %s4484_s15, %s4485_s13  }
  0x2e   : > { %s499_s25 = sshll.u32 %s4505_s10, 4  ;;  %s3587_s18 = smov [#allocation16]   ;;  %s500_s25 = int_to_ptr.hbm [resolvable:$true] %s499_s25 }
  0x2f   : > { %3000 = dma.hbm_to_vmem [thread:$0]  (!%p3721_p6), %s500_s25, 512, %s502_s17, [#allocation12], %s4484_s15, %s4484_s15, %s4485_s13  }
  0x30   : > { %s535_s2 = sshll.u32 %s3587_s18, 4  ;;  %s2814_s30 = sadd.s32 4294967294, %s3576_s24   ;;  %s536_s2 = int_to_ptr.vmem [resolvable:$true] %s535_s2 }
  0x31   : > { %3006 = dma.hbm_to_vmem [thread:$0]  (!%p3721_p6), %s534_s16, 512, %s536_s2, [#allocation15], %s4484_s15, %s4484_s15, %s4485_s13  }
  0x32   : > { %s61_s8 = ssub.s32 %s3576_s24, %s3782_s4  ;;  %s64_s11 = sadd.s32 1, %s3572_s23 }
  0x33   : > { %p62_p7 = scmp.eq.s32.totalorder %s61_s8, 0  ;;  %p71_p8 = scmp.ne.s32.totalorder %s3572_s23, %s3568_s22 }
  0x34   : > { %p72_p9 = scmp.eq.s32.totalorder %s3576_s24, 0  ;;  %p77_p10 = scmp.ne.s32.totalorder %s3568_s22, %s3564_s21 }
  0x35   : > { %s3793_s26 = scalar_select %p62_p7, %s3572_s23, %s64_s11  }
  0x36   : > { %p3797_p11 = por %p78_p1, %p77_p10  ;;  %p395_p12 = scmp.eq.s32.totalorder %s3704_s28, 1 }
  0x37   : > { %p401_p13 = scmp.eq.s32.totalorder %s2814_s30, 1  ;;  %p3802_p0 = por %p72_p9, %p71_p8 }
  0x38   : > { %p3023_p2 = scmp.lt.s32.totalorder %s3576_s24, 2  ;;  %p3807_p4 = por %p395_p12, %p71_p8 }
  0x39   : > { %p3811_p6 = por %p401_p13, %p77_p10  ;;  %s552_s16 = sand.u32 1, %s3576_s24  }
  0x3a   : > { %s554_s19 = sand.u32 1, %s3572_s23   ;;  %s2941_s18 = sshll.u32 %s3576_s24, 5 }
  0x3b   : > { %s2825_s17 = sshll.u32 %s554_s19, 5  ;;  %s562_s8 = scalar_lea.hbm %s4467_s1, %s2941_s18 }
  0x3c   : > { %s563_s11 = sshll.u32 %s562_s8, 4  ;;  %s556_s15 = scalar_lea.vmem [#allocation5], %s2825_s17  ;;  %s564_s11 = int_to_ptr.hbm [resolvable:$true] %s563_s11 }
  0x3d   : > { %s565_s13 = sshll.u32 %s556_s15, 4  ;;  %p3825_p7 = pnand %p3023_p2, %p3802_p0  ;;  %s566_s13 = int_to_ptr.vmem [resolvable:$true] %s565_s13 }
  0x3e   : > { %s553_s10 = scalar_lea.sflag [#allocation6], %s552_s16  ;;  %s3460_s12 = sshra.s32 %s564_s11, 4  ;;  %s3461_s12 = int_to_ptr.hbm [resolvable:$true] %s3460_s12 }
  0x3f   : > { %s3462_s19 = scalar_lea.hbm %s3461_s12, 32  ;;  %p3464_p9 = pneg %p3825_p7 }
  0x40   : > { %p3463_p8 = scmp.ne.s32.totalorder %s3461_s12, %s3462_s19  ;;  %s3467_s18 = scalar_lea.hbm %s4467_s1, 64 }
  0x41   : > { %p3468_p13 = scmp.lt.s32.totalorder %s3461_s12, %s4467_s1  ;;  %p3469_p0 = scmp.lt.s32.totalorder %s3467_s18, %s3462_s19 }
  0x42   : > { %p3465_p10 = pnand %p3464_p9, %p3463_p8 }
  0x43   : > { %p3470_p2 = por %p3469_p0, %p3468_p13 }
  0x44   : > { %p3466_p12 = pneg %p3465_p10 }
  0x46   : > { %p3471_p5 = pnand %p3470_p2, %p3466_p12 }
  0x48   : > { %3474 = shalt.err (!%p3471_p5)
}
  0x49   : > { %s4511_s16 = smov 8   ;;  %s4512_s30 = smov 128  }
  0x4a   : > { %3010 = dma.hbm_to_vmem [thread:$0]  (!%p3825_p7), %s564_s11, 512, %s566_s13, %s553_s10, %s4512_s30, %s4512_s30, %s4511_s16  }
  0x4b   : > { %577 = sbr.rel (%p3709_p3) target bundleno = 2430 (0x97e), region = 84 }
  0x50   : > { %3535 = dma.done.wait (%p78_p1), [#allocation3], 128  }
  0x51   : > { %3537 = vsyncadd (%p78_p1), [#allocation3], 4294967168  ;;  %s584_s12 = sand.u32 1, %s3704_s28   ;;  %s586_s8 = sand.u32 1, %s3568_s22  }
  0x52   : > { %s3852_s6 = sshll.u32 %s586_s8, 5  ;;  %s585_s10 = scalar_lea.sflag [#allocation6], %s584_s12 }
  0x53   : > { %s588_s13 = scalar_lea.vmem [#allocation5], %s3852_s6 }
  0x54   : > { %3539 = dma.done.wait (%p3797_p11), %s585_s10, 512  }
  0x55   : > { %3541 = vsyncadd (%p3797_p11), %s585_s10, 4294966784 }
  0x56   : > { %3543 = dma.done.wait (%p78_p1), [#allocation6], 256  }
  0x57   : > { %3545 = vsyncadd (%p78_p1), [#allocation6], 4294967040 }
  0x58   : > { %3547 = dma.done.wait (%p78_p1), [#allocation9], 768  }
  0x59   : > { %3549 = vsyncadd (%p78_p1), [#allocation9], 4294966528 }
  0x5a   : > { %3551 = dma.done.wait (%p78_p1), [#allocation12], 768  }
  0x5b   : > { %3553 = vsyncadd (%p78_p1), [#allocation12], 4294966528 }
  0x5c   : > { %3555 = dma.done.wait (%p78_p1), [#allocation15], 1024  }
  0x5d   : > { %3557 = vsyncadd (%p78_p1), [#allocation15], 4294966272  ;;  %v680_v0 = vld [vmem:[#allocation7 + $0x8] sm:$0xff]  ;;  %v679_v1 = vld [vmem:[#allocation7] sm:$0xff]  ;;  %vm685_vm0 = vcmask 130048   ;;  %vm763_vm1 = vcmask 64512  }
  0x5e   : > { %712 = vmatpush.msra.mxu0 %v680_v0  ;;  %v3875_v2 = vld [vmem:[%s588_s13] sm:$0xff]  ;;  %v728_v3 = vld [vmem:[#allocation8 + $0x8] sm:$0xff]  ;;  %v727_v4 = vld [vmem:[#allocation8] sm:$0xff]  ;;  %s3588_s11 = smov 120   ;;  %s3589_s15 = smov 112  }
  0x5f   : > { %2944 = vmatpush.msra.mxu2 %v728_v3  ;;  %747 = vmatpush.msra.mxu1 %v728_v3  ;;  %v3877_v5 = vld [vmem:[%s588_s13 + $0x10] sm:$0xff]  ;;  %v3885_v6 = vld [vmem:[%s588_s13 + $0x8] sm:$0xff]  ;;  %v3889_v7 = vld [vmem:[%s588_s13 + $0x18] sm:$0xff]  ;;  %s3590_s18 = smov 104   ;;  %s3591_s25 = smov 8  }
  0x60   : > { %713 = vmatpush.msra.mxu0 %v679_v1  ;;  %v3117_v9 = vld [vmem:[%s4469_s3] ss:$0 sm:$0xff]  ;;  %s3592_s2 = smov 16   ;;  %s3593_s16 = smov 24  }
  0x61   : > { %2840 = vmatmul.msk.f32.vlgmr.msra.gmra.mxu0 %vm685_vm0, %v3875_v2  ;;  %2945 = vmatpush.msra.mxu2 %v727_v4  ;;  %v3904_v13 = vld [vmem:[#allocation2] sm:$0xff]  ;;  %s4515_s19 = sld [smem:[#allocation31_spill]]  ;;  %s2647_s17 = scalar_lea.sflag [#allocation4], %s586_s8 }
  0x62   : > { %2846 = vmatmul.msk.f32.vlgmr.msra.gmra.mxu2 %vm685_vm0, %v3877_v5  ;;  %748 = vmatpush.msra.mxu1 %v727_v4  ;;  %v3118_v19 = vld [vmem:[%s4471_s5] ss:$0 sm:$0xff]  ;;  %s4516_s12 = sld [smem:[#allocation33_spill]] }
  0x63   : > { %2844 = vmatmul.msk.f32.vlgmr.msra.gmra.mxu1 %vm685_vm0, %v3875_v2  ;;  %s4520_s29 = sld [smem:[#allocation35_spill]] }
  0x69   : > { %2841 = vmatmul.msk.f32.gmra.mxu0 %vm685_vm0, %v3885_v6 }
  0x6a   : > { %2847 = vmatmul.msk.f32.gmra.mxu2 %vm685_vm0, %v3889_v7 }
  0x6b   : > { %2845 = vmatmul.msk.f32.gmra.mxu1 %vm685_vm0, %v3885_v6 }
  0x71   : > { %2842 = vmatmul.msk.f32.gmra.mxu0 %vm685_vm0, %v3877_v5 }
  0x79   : > { %2843 = vmatmul.msk.f32.gmra.mxu0 %vm685_vm0, %v3889_v7 }
  0xde   : > { %v715_v8 = vpop.f32.mrf.mxu0 }
  0xdf   : > { %v716_v12 = vadd.f32 %v3117_v9, %v715_v8 }
  0xe0   : > { %v750_v24 = vpop.f32.mrf.mxu1 }
  0xe1   : > { %v3932_v26 = vadd.f32 %v3118_v19, %v750_v24 }
  0xe5   : > { %v756_v16 = vpop.f32.mrf.mxu2 }
  0xe6   : > { %v718_v10 = vpop.f32.mrf.mxu0  ;;  %v757_v22 = vadd.f32 %v3118_v19, %v756_v16 }
  0xe7   : > { %v719_v11 = vadd.f32 %v3117_v9, %v718_v10 }
  0xe8   : > { %v753_v25 = vpop.f32.mrf.mxu1 }
  0xe9   : > { %2848 = vmatpush.xpose.msk.msrb.mxu2 %vm763_vm1, %v719_v11  ;;  %v754_v27 = vadd.f32 %v3118_v19, %v753_v25 }
  0xeb   : > { %v3087_v58 = vpack.i.bf16 %v3932_v26, %v754_v27 }
  0xed   : > { %2849 = vmatpush.xpose.msk.msrb.mxu2 %vm763_vm1, %v716_v12  ;;  %v759_v20 = vpop.f32.mrf.mxu2 }
  0xee   : > { %v721_v14 = vpop.f32.mrf.mxu0  ;;  %v760_v21 = vadd.f32 %v3118_v19, %v759_v20 }
  0xef   : > { %v3906_v15 = vadd.f32 %v3117_v9, %v721_v14 }
  0xf0   : > { %2850 = vmatmul.msk.f32.vlgmr.msrb.gmra.mxu2 %vm763_vm1, %v3904_v13  ;;  %v3923_v23 = vpack.i.bf16 %v757_v22, %v760_v21 }
  0xf1   : > { %947 = vrot.lane.b32.xlu1 %v3906_v15, %s3588_s11  ;;  %882 = vmatpush.msra.mxu2 %v754_v27 }
  0xf3   : > { %883 = vmatpush.msra.mxu2 %v3932_v26 }
  0xf6   : > { %v724_v17 = vpop.f32.mrf.mxu0 }
  0xf7   : > { %v725_v18 = vadd.f32 %v3117_v9, %v724_v17 }
  0xf9   : > { %2851 = vmatpush.xpose.msk.msra.mxu3 %vm763_vm1, %v725_v18  ;;  %915 = vrot.lane.b32.xlu1 %v3904_v13, %s3588_s11 }
  0xfd   : > { %2852 = vmatpush.xpose.msk.msra.mxu3 %vm763_vm1, %v3906_v15 }
 0x100   : > { %2853 = vmatmul.msk.f32.vlgmr.msra.gmra.mxu3 %vm763_vm1, %v3904_v13 }
 0x101   : > { %905 = vmatpush.msrb.mxu3 %v760_v21  ;;  %919 = vrot.lane.b32.xlu1 %v719_v11, %s3588_s11 }
 0x103   : > { %906 = vmatpush.msrb.mxu3 %v757_v22 }
 0x109   : > { %3083 = vrot.lane.b32.xlu1 %v3923_v23, %s3588_s11 }
 0x111   : > { %1097 = vrot.lane.b32.xlu1 %v716_v12, %s3589_s15 }
 0x119   : > { %1275 = vrot.lane.b32.xlu1 %v719_v11, %s3590_s18 }
 0x121   : > { %1129 = vrot.lane.b32.xlu1 %v725_v18, %s3589_s15 }
 0x129   : > { %1303 = vrot.lane.b32.xlu1 %v3906_v15, %s3590_s18 }
 0x131   : > { %3088 = vrot.lane.b32.xlu1 %v3087_v58, %s3588_s11 }
 0x163   : > { %v948_v28 = vpop.permute.xlu1 %947 }
 0x16b   : > { %v916_v29 = vpop.permute.xlu1 %915 }
 0x173   : > { %v920_v30 = vpop.permute.xlu1 %919  ;;  %v790_v31 = vpop.f32.mrf.mxu2 }
 0x174   : > { %2856 = vmatpush.xpose.msk.msrb.mxu2 %vm763_vm1, %v920_v30  ;;  %v819_v32 = vsel %vm685_vm0, %v790_v31, -inf }
 0x175   : > { %820 = vmax.xlane.f32.xlu2 %v819_v32 }
 0x17b   : > { %v3084_v33 = vpop.permute.xlu1 %3083 }
 0x17c   : > { %v3085_v50 = vunpack.i.l.bf16 %v3084_v33  ;;  %v3086_v51 = vunpack.i.h.bf16 %v3084_v33 }
 0x183   : > { %v816_v34 = vpop.f32.mrf.mxu3  ;;  %v1098_v35 = vpop.permute.xlu1 %1097 }
 0x184   : > { %v822_v36 = vsel %vm685_vm0, %v816_v34, -inf }
 0x185   : > { %823 = vmax.xlane.f32.xlu0 %v822_v36 }
 0x18b   : > { %v1276_v37 = vpop.permute.xlu1 %1275 }
 0x18c   : > { %2872 = vmatpush.xpose.msk.msrb.mxu0 %vm763_vm1, %v1276_v37 }
 0x18d   : > { %917 = vrot.lane.b32.xlu2 %v716_v12, %s3588_s11 }
 0x193   : > { %v1130_v38 = vpop.permute.xlu1 %1129 }
 0x194   : > { %2867 = vmatpush.xpose.msk.msrb.mxu1 %vm763_vm1, %v1130_v38 }
 0x195   : > { %1273 = vrot.lane.b32.xlu2 %v716_v12, %s3590_s18 }
 0x199   : > { %949 = vrot.lane.b32.xlu0 %v725_v18, %s3588_s11 }
 0x19b   : > { %v1304_v10 = vpop.permute.xlu1 %1303 }
 0x1a1   : > { %1099 = vrot.lane.b32.xlu0 %v719_v11, %s3589_s15 }
 0x1a3   : > { %v3089_v11 = vpop.permute.xlu1 %3088 }
 0x1a4   : > { %v3091_v12 = vunpack.i.h.bf16 %v3089_v11  ;;  %v3090_v14 = vunpack.i.l.bf16 %v3089_v11 }
 0x1a9   : > { %1095 = vrot.lane.b32.xlu0 %v3904_v13, %s3589_s15 }
 0x1b1   : > { %1271 = vrot.lane.b32.xlu0 %v3904_v13, %s3590_s18 }
 0x1b9   : > { %1305 = vrot.lane.b32.xlu0 %v725_v18, %s3590_s18 }
 0x1e8   : > { %v821_v39 = vpop.xlane.xlu2 %820 }
 0x1e9   : > { %v825_v40 = vsub.f32 %v790_v31, %v821_v39 }
 0x1eb   : > { %v827_v41 = vmul.f32 1.442695, %v825_v40 }
 0x1ed   : > { %3124 = vpow2.f32 %v827_v41 }
 0x1f0   : > { %v918_v42 = vpop.permute.xlu2 %917 }
 0x1f1   : > { %2857 = vmatpush.xpose.msk.msrb.mxu2 %vm763_vm1, %v918_v42 }
 0x1f3   : > { %v3950_v43 = vpop.eup %3124 }
 0x1f4   : > { %2854 = vmatmul.msk.f32.vlgmr.msra.gmra.mxu2 %vm685_vm0, %v3950_v43 }
 0x1f5   : > { %1046 = vmatpush.msra.mxu2 %v3090_v14 }
 0x1f7   : > { %1047 = vmatpush.msra.mxu2 %v3091_v12 }
 0x1f8   : > { %v824_v44 = vpop.xlane.xlu0 %823  ;;  %v1274_v45 = vpop.permute.xlu2 %1273 }
 0x1f9   : > { %v826_v46 = vsub.f32 %v816_v34, %v824_v44  ;;  %2873 = vmatpush.xpose.msk.msrb.mxu0 %vm763_vm1, %v1274_v45 }
 0x1fb   : > { %v829_v47 = vmul.f32 1.442695, %v826_v46 }
 0x1fc   : > { %2858 = vmatmul.msk.f32.vlgmr.msrb.gmra.mxu2 %vm763_vm1, %v916_v29 }
 0x1fd   : > { %3126 = vpow2.f32 %v829_v47 }
 0x203   : > { %v3956_v48 = vpop.eup %3126 }
 0x204   : > { %2855 = vmatmul.msk.f32.vlgmr.msrb.gmra.mxu3 %vm685_vm0, %v3956_v48 }
 0x20b   : > { %v950_v49 = vpop.permute.xlu0 %949 }
 0x20c   : > { %2859 = vmatpush.xpose.msk.msra.mxu3 %vm763_vm1, %v950_v49 }
 0x210   : > { %2860 = vmatpush.xpose.msk.msra.mxu3 %vm763_vm1, %v948_v28 }
 0x213   : > { %2861 = vmatmul.msk.f32.vlgmr.msra.gmra.mxu3 %vm763_vm1, %v916_v29  ;;  %v1100_v52 = vpop.permute.xlu0 %1099 }
 0x214   : > { %1077 = vmatpush.msrb.mxu3 %v3085_v50 }
 0x216   : > { %1078 = vmatpush.msrb.mxu3 %v3086_v51 }
 0x218   : > { %2864 = vmatpush.xpose.msk.msra.mxu3 %vm763_vm1, %v1100_v52 }
 0x21b   : > { %v1096_v53 = vpop.permute.xlu0 %1095 }
 0x21c   : > { %2865 = vmatpush.xpose.msk.msra.mxu3 %vm763_vm1, %v1098_v35 }
 0x223   : > { %v1272_v54 = vpop.permute.xlu0 %1271 }
 0x224   : > { %2874 = vmatmul.msk.f32.vlgmr.msrb.gmra.mxu0 %vm763_vm1, %v1272_v54 }
 0x22b   : > { %v1306_v8 = vpop.permute.xlu0 %1305 }
 0x277   : > { %v3973_v59 = vpop.f32.mrf.mxu2 }
 0x27f   : > { %v944_v60 = vpop.f32.mrf.mxu2 }
 0x280   : > { %v975_v61 = vsel %vm685_vm0, %v944_v60, -inf }
 0x287   : > { %v3966_v55 = vpop.f32.mrf.mxu3 }
 0x296   : > { %v972_v56 = vpop.f32.mrf.mxu3 }
 0x297   : > { %v978_v57 = vsel %vm685_vm0, %v972_v56, -inf }
 0x298   : > { %979 = vmax.xlane.f32.xlu2 %v978_v57  ;;  %v834_v57 = vsel %vm685_vm0, %v3956_v48, 0.0 }
 0x2a1   : > { %v1300_v62 = vpop.f32.mrf.mxu0 }
 0x2a2   : > { %v1331_v63 = vsel %vm685_vm0, %v1300_v62, -inf }
 0x2a3   : > { %1332 = vmax.xlane.f32.xlu1 %v1331_v63 }
 0x2b0   : > { %1127 = vrot.lane.b32.xlu2 %v3906_v15, %s3589_s15 }
 0x2d9   : > { %976 = vmax.xlane.f32.xlu2 %v975_v61 }
 0x2f1   : > { %3093 = vrot.lane.b32.xlu2 %v3087_v58, %s3589_s15 }
 0x2f9   : > { %3103 = vrot.lane.b32.xlu2 %v3923_v23, %s3589_s15 }
 0x30b   : > { %v980_v0 = vpop.xlane.xlu2 %979 }
 0x30c   : > { %v982_v1 = vsub.f32 %v972_v56, %v980_v0 }
 0x30e   : > { %v985_v3 = vmul.f32 1.442695, %v982_v1 }
 0x310   : > { %3128 = vpow2.f32 %v985_v3 }
 0x313   : > { %v1128_v4 = vpop.permute.xlu2 %1127 }
 0x314   : > { %2868 = vmatpush.xpose.msk.msrb.mxu1 %vm763_vm1, %v1128_v4 }
 0x316   : > { %v3129_v9 = vpop.eup %3128  ;;  %v1333_v35 = vpop.xlane.xlu1 %1332 }
 0x317   : > { %2863 = vmatmul.msk.f32.vlgmr.msrb.gmra.mxu3 %vm685_vm0, %v3129_v9  ;;  %2869 = vmatmul.msk.f32.vlgmr.msrb.gmra.mxu1 %vm763_vm1, %v1096_v53  ;;  %v990_v27 = vsel %vm685_vm0, %v3129_v9, 0.0  ;;  %v1337_v36 = vsub.f32 %v1300_v62, %v1333_v35 }
 0x318   : > { %2875 = vmatpush.xpose.msk.msra.mxu1 %vm763_vm1, %v1306_v8  ;;  %v831_v8 = vsel %vm685_vm0, %v3950_v43, 0.0 }
 0x319   : > { %v1339_v37 = vmul.f32 1.442695, %v1337_v36 }
 0x31c   : > { %2876 = vmatpush.xpose.msk.msra.mxu1 %vm763_vm1, %v1304_v10 }
 0x31f   : > { %2866 = vmatmul.msk.f32.vlgmr.msra.gmra.mxu3 %vm763_vm1, %v1096_v53  ;;  %2877 = vmatmul.msk.f32.vlgmr.msra.gmra.mxu1 %vm763_vm1, %v1272_v54 }
 0x34c   : > { %v977_v15 = vpop.xlane.xlu2 %976 }
 0x34d   : > { %v981_v16 = vsub.f32 %v944_v60, %v977_v15 }
 0x34f   : > { %v983_v17 = vmul.f32 1.442695, %v981_v16 }
 0x351   : > { %3130 = vpow2.f32 %v983_v17 }
 0x352   : > { %3132 = vpow2.f32 %v1339_v37 }
 0x354   : > { %v3094_v18 = vpop.permute.xlu2 %3093 }
 0x355   : > { %v3096_v19 = vunpack.i.h.bf16 %v3094_v18  ;;  %v3095_v20 = vunpack.i.l.bf16 %v3094_v18 }
 0x357   : > { %v3131_v21 = vpop.eup %3130  ;;  %1224 = vmatpush.msrb.mxu2 %v3095_v20 }
 0x358   : > { %2862 = vmatmul.msk.f32.vlgmr.msra.gmra.mxu2 %vm685_vm0, %v3131_v21  ;;  %v987_v22 = vsel %vm685_vm0, %v3131_v21, 0.0  ;;  %v3133_v38 = vpop.eup %3132 }
 0x359   : > { %988 = vadd.xlane.f32.xlu2 %v987_v22  ;;  %1225 = vmatpush.msrb.mxu2 %v3096_v19  ;;  %v1343_v39 = vsel %vm685_vm0, %v3133_v38, 0.0 }
 0x35c   : > { %v3104_v24 = vpop.permute.xlu2 %3103 }
 0x35d   : > { %v3105_v25 = vunpack.i.l.bf16 %v3104_v24  ;;  %v3106_v26 = vunpack.i.h.bf16 %v3104_v24 }
 0x35f   : > { %1253 = vmatpush.msrb.mxu3 %v3105_v25 }
 0x361   : > { %991 = vadd.xlane.f32.xlu2 %v990_v27  ;;  %1254 = vmatpush.msrb.mxu3 %v3106_v26 }
 0x394   : > { %v1152_v28 = vpop.f32.mrf.mxu1 }
 0x395   : > { %v1158_v29 = vsel %vm685_vm0, %v1152_v28, -inf }
 0x396   : > { %1159 = vmax.xlane.f32.xlu0 %v1158_v29 }
 0x39a   : > { %v3991_v30 = vpop.f32.mrf.mxu3 }
 0x39c   : > { %v1328_v31 = vpop.f32.mrf.mxu1 }
 0x39d   : > { %v1334_v32 = vsel %vm685_vm0, %v1328_v31, -inf }
 0x39e   : > { %1335 = vmax.xlane.f32.xlu1 %v1334_v32 }
 0x3a2   : > { %v1124_v33 = vpop.f32.mrf.mxu3 }
 0x3a3   : > { %v1155_v34 = vsel %vm685_vm0, %v1124_v33, -inf }
 0x3a4   : > { %1156 = vmax.xlane.f32.xlu0 %v1155_v34 }
 0x3b7   : > { %3108 = vrot.lane.b32.xlu1 %v3923_v23, %s3590_s18 }
 0x3b8   : > { %3098 = vrot.lane.b32.xlu0 %v3087_v58, %s3590_s18 }
 0x3cc   : > { %v989_v54 = vpop.xlane.xlu2 %988 }
 0x3cd   : > { %v1004_v16 = vand.u32 2147483648, %v989_v54  ;;  %vm998_vm3 = vweird.f32 %v989_v54  ;;  %v1002_v17 = vand.u32 2147483647, %v989_v54 }
 0x3cf   : > { %v1005_v20 = vor.u32 1.1754944e-38, %v1004_v16  ;;  %vm1003_vm5 = vcmp.eq.f32.partialorder %v1002_v17, 8.507059e+37 }
 0x3d4   : > { %v992_v0 = vpop.xlane.xlu2 %991 }
 0x3d5   : > { %v1018_v43 = vand.u32 2147483648, %v992_v0  ;;  %vm1012_vm7 = vweird.f32 %v992_v0  ;;  %v1016_v26 = vand.u32 2147483647, %v992_v0 }
 0x3d7   : > { %vm1017_vm9 = vcmp.eq.f32.partialorder %v1016_v26, 8.507059e+37 }
 0x3db   : > { %v1049_v24 = vpop.f32.mrf.mxu2 }
 0x3e1   : > { %1344 = vadd.xlane.f32.xlu1 %v1343_v39 }
 0x409   : > { %v1160_v40 = vpop.xlane.xlu0 %1159 }
 0x40a   : > { %v1162_v41 = vsub.f32 %v1152_v28, %v1160_v40  ;;  %v1019_v28 = vor.u32 1.1754944e-38, %v1018_v43 }
 0x40c   : > { %v1165_v42 = vmul.f32 1.442695, %v1162_v41 }
 0x40e   : > { %3134 = vpow2.f32 %v1165_v42 }
 0x411   : > { %v1336_v44 = vpop.xlane.xlu1 %1335 }
 0x412   : > { %v1338_v45 = vsub.f32 %v1328_v31, %v1336_v44 }
 0x414   : > { %v3135_v46 = vpop.eup %3134  ;;  %v1341_v47 = vmul.f32 1.442695, %v1338_v45 }
 0x415   : > { %2871 = vmatmul.msk.f32.vlgmr.msrb.gmra.mxu3 %vm685_vm0, %v3135_v46  ;;  %v1170_v63 = vsel %vm685_vm0, %v3135_v46, 0.0 }
 0x416   : > { %3136 = vpow2.f32 %v1341_v47 }
 0x417   : > { %v1157_v23 = vpop.xlane.xlu0 %1156 }
 0x418   : > { %v1161_v49 = vsub.f32 %v1124_v33, %v1157_v23 }
 0x41a   : > { %v1163_v50 = vmul.f32 1.442695, %v1161_v49 }
 0x41c   : > { %v3137_v51 = vpop.eup %3136  ;;  %3138 = vpow2.f32 %v1163_v50 }
 0x41d   : > { %v1346_v52 = vsel %vm685_vm0, %v3137_v51, 0.0  ;;  %3140 = vrcp.f32 %v989_v54 }
 0x41e   : > { %1347 = vadd.xlane.f32.xlu2 %v1346_v52  ;;  %3142 = vrcp.f32 %v992_v0 }
 0x422   : > { %v3139_v53 = vpop.eup %3138 }
 0x423   : > { %2870 = vmatmul.msk.f32.vlgmr.msrb.gmra.mxu2 %vm685_vm0, %v3139_v53  ;;  %v1167_v56 = vsel %vm685_vm0, %v3139_v53, 0.0  ;;  %v3141_v3 = vpop.eup %3140 }
 0x424   : > { %1168 = vadd.xlane.f32.xlu0 %v1167_v56  ;;  %v994_v48 = vmul.f32 %v3141_v3, %v989_v54  ;;  %v3143_v10 = vpop.eup %3142  ;;  %vm999_vm2 = vweird.f32 %v3141_v3 }
 0x425   : > { %v1008_v11 = vmul.f32 %v3143_v10, %v992_v0  ;;  %vm1000_vm4 = vmor %vm998_vm3, %vm999_vm2  ;;  %vm1013_vm6 = vweird.f32 %v3143_v10 }
 0x426   : > { %835 = vadd.xlane.f32.xlu2 %v834_v57  ;;  %v995_v9 = vsub.f32 1.0, %v994_v48  ;;  %vm1014_vm8 = vmor %vm1012_vm7, %vm1013_vm6 }
 0x427   : > { %v1009_v14 = vsub.f32 1.0, %v1008_v11 }
 0x428   : > { %v996_v12 = vmul.f32 %v3141_v3, %v995_v9 }
 0x429   : > { %v3109_v58 = vpop.permute.xlu1 %3108  ;;  %v1010_v18 = vmul.f32 %v3143_v10, %v1009_v14 }
 0x42a   : > { %v3110_v60 = vunpack.i.l.bf16 %v3109_v58  ;;  %v3099_v61 = vpop.permute.xlu0 %3098  ;;  %v3111_v1 = vunpack.i.h.bf16 %v3109_v58  ;;  %v997_v15 = vadd.f32 %v3141_v3, %v996_v12 }
 0x42b   : > { %v3100_v62 = vunpack.i.l.bf16 %v3099_v61  ;;  %v3101_v4 = vunpack.i.h.bf16 %v3099_v61  ;;  %v1011_v22 = vadd.f32 %v3143_v10, %v1010_v18 }
 0x42c   : > { %1171 = vadd.xlane.f32.xlu0 %v1170_v63  ;;  %1429 = vmatpush.msra.mxu3 %v3110_v60  ;;  %v1001_v19 = vsel %vm1000_vm4, %v3141_v3, %v997_v15 }
 0x42d   : > { %1400 = vmatpush.msra.mxu2 %v3100_v62  ;;  %v1006_v21 = vsel %vm1003_vm5, %v1005_v20, %v1001_v19  ;;  %v1015_v27 = vsel %vm1014_vm8, %v3143_v10, %v1011_v22 }
 0x42e   : > { %1430 = vmatpush.msra.mxu3 %v3111_v1  ;;  %v1083_v25 = vmul.f32 %v1049_v24, %v1006_v21  ;;  %v1020_v29 = vsel %vm1017_vm9, %v1019_v28, %v1015_v27  ;;  %v1457_v27 = vld [vmem:[#allocation10 + $0x18] sm:$0xff]  ;;  %v1456_v28 = vld [vmem:[#allocation10 + $0x10] sm:$0xff] }
 0x42f   : > { %1401 = vmatpush.msra.mxu2 %v3101_v4  ;;  %2879 = vmatmul.msk.f32.vlgmr.msra.gmra.mxu3 %vm685_vm0, %v3137_v51  ;;  %v1084_v31 = vmul.f32 %v3991_v30, %v1020_v29 }
 0x430   : > { %2878 = vmatmul.msk.f32.vlgmr.msra.gmra.mxu2 %vm685_vm0, %v3133_v38  ;;  %1481 = vmatpush.msra.mxu0 %v1457_v27 }
 0x432   : > { %1482 = vmatpush.msra.mxu0 %v1456_v28 }
 0x434   : > { %832 = vadd.xlane.f32.xlu0 %v831_v8 }
 0x448   : > { %1087 = vrot.lane.b32.xlu0 %v1083_v25, %s3591_s25 }
 0x450   : > { %1089 = vrot.lane.b32.xlu0 %v1084_v31, %s3591_s25 }
 0x454   : > { %v4015_v33 = vpop.xlane.xlu1 %1344 }
 0x455   : > { %v1360_v9 = vand.u32 2147483648, %v4015_v33  ;;  %vm1354_vm6 = vweird.f32 %v4015_v33  ;;  %v1358_v12 = vand.u32 2147483647, %v4015_v33 }
 0x457   : > { %v1361_v19 = vor.u32 1.1754944e-38, %v1360_v9 }
 0x491   : > { %v4013_v32 = vpop.xlane.xlu2 %1347 }
 0x492   : > { %3144 = vrcp.f32 %v4013_v32  ;;  %vm1368_vm2 = vweird.f32 %v4013_v32  ;;  %v1374_v3 = vand.u32 2147483648, %v4013_v32  ;;  %v1372_v8 = vand.u32 2147483647, %v4013_v32 }
 0x493   : > { %3146 = vrcp.f32 %v4015_v33 }
 0x494   : > { %v1375_v16 = vor.u32 1.1754944e-38, %v1374_v3 }
 0x497   : > { %v1169_v34 = vpop.xlane.xlu0 %1168 }
 0x498   : > { %3148 = vrcp.f32 %v1169_v34  ;;  %v4019_v35 = vpop.eup %3144  ;;  %v1184_v42 = vand.u32 2147483648, %v1169_v34  ;;  %v1182_v46 = vand.u32 2147483647, %v1169_v34  ;;  %vm1178_vm11 = vweird.f32 %v1169_v34  ;;  %v1256_v61 = vpop.f32.mrf.mxu3 }
 0x499   : > { %v4021_v36 = vpop.eup %3146  ;;  %v1364_v30 = vmul.f32 %v4019_v35, %v4013_v32  ;;  %vm1369_vm14 = vweird.f32 %v4019_v35  ;;  %v836_v32 = vpop.xlane.xlu2 %835 }
 0x49a   : > { %v1350_v40 = vmul.f32 %v4021_v36, %v4015_v33  ;;  %v1185_v50 = vor.u32 1.1754944e-38, %v1184_v42  ;;  %vm1183_vm13 = vcmp.eq.f32.partialorder %v1182_v46, 8.507059e+37  ;;  %vm1355_vm3 = vweird.f32 %v4021_v36  ;;  %vm4036_vm5 = vmor %vm1368_vm2, %vm1369_vm14  ;;  %v1455_v33 = vld [vmem:[#allocation10 + $0x8] sm:$0xff] }
 0x49b   : > { %v1365_v44 = vsub.f32 1.0, %v1364_v30  ;;  %vm1356_vm8 = vmor %vm1354_vm6, %vm1355_vm3  ;;  %1483 = vmatpush.msra.mxu0 %v1455_v33  ;;  %vm856_vm3 = vweird.f32 %v836_v32  ;;  %vm1451_vm6 = vcmask 195584  }
 0x49c   : > { %v1351_v47 = vsub.f32 1.0, %v1350_v40  ;;  %v1496_v40 = vld [vmem:[#allocation11] sm:$0xff] }
 0x49d   : > { %v1366_v53 = vmul.f32 %v4019_v35, %v1365_v44 }
 0x49e   : > { %v3149_v37 = vpop.eup %3148  ;;  %v1352_v57 = vmul.f32 %v4021_v36, %v1351_v47 }
 0x49f   : > { %v1174_v38 = vmul.f32 %v3149_v37, %v1169_v34  ;;  %v1172_v39 = vpop.xlane.xlu0 %1171  ;;  %vm1179_vm10 = vweird.f32 %v3149_v37  ;;  %v1367_v0 = vadd.f32 %v4019_v35, %v1366_v53  ;;  %v1454_v34 = vld [vmem:[#allocation10] sm:$0xff]  ;;  %v862_v53 = vand.u32 2147483648, %v836_v32 }
 0x4a0   : > { %3150 = vrcp.f32 %v1172_v39  ;;  %vm1180_vm12 = vmor %vm1178_vm11, %vm1179_vm10  ;;  %v1198_v62 = vand.u32 2147483648, %v1172_v39  ;;  %v1196_v1 = vand.u32 2147483647, %v1172_v39  ;;  %v1353_v4 = vadd.f32 %v4021_v36, %v1352_v57  ;;  %1484 = vmatpush.msra.mxu0 %v1454_v34 }
 0x4a1   : > { %v1175_v41 = vsub.f32 1.0, %v1174_v38  ;;  %vm1192_vm4 = vweird.f32 %v1172_v39  ;;  %v1371_v14 = vsel %vm4036_vm5, %v4019_v35, %v1367_v0  ;;  %vm1373_vm10 = vcmp.eq.f32.partialorder %v1372_v8, 8.507059e+37 }
 0x4a2   : > { %v1199_v11 = vor.u32 1.1754944e-38, %v1198_v62  ;;  %vm1197_vm9 = vcmp.eq.f32.partialorder %v1196_v1, 8.507059e+37  ;;  %v1357_v17 = vsel %vm1356_vm8, %v4021_v36, %v1353_v4  ;;  %v1376_v21 = vsel %vm1373_vm10, %v1375_v16, %v1371_v14  ;;  %v1571_v16 = vld [vmem:[#allocation14 + $0x18] sm:$0xff] }
 0x4a3   : > { %v1176_v45 = vmul.f32 %v3149_v37, %v1175_v41  ;;  %vm1359_vm11 = vcmp.eq.f32.partialorder %v1358_v12, 8.507059e+37  ;;  %1588 = vmatpush.msrb.mxu3 %v1571_v16 }
 0x4a4   : > { %v1362_v24 = vsel %vm1359_vm11, %v1361_v19, %v1357_v17  ;;  %v1533_v17 = vld [vmem:[#allocation13 + $0x10] sm:$0xff]  ;;  %v1532_v19 = vld [vmem:[#allocation13 + $0x8] sm:$0xff] }
 0x4a5   : > { %v1177_v23 = vadd.f32 %v3149_v37, %v1176_v45 }
 0x4a6   : > { %v3151_v49 = vpop.eup %3150  ;;  %v1227_v56 = vpop.f32.mrf.mxu2 }
 0x4a7   : > { %v1188_v51 = vmul.f32 %v3151_v49, %v1172_v39  ;;  %v1181_v52 = vsel %vm1180_vm12, %v3149_v37, %v1177_v23  ;;  %vm1193_vm15 = vweird.f32 %v3151_v49  ;;  %v833_v29 = vpop.xlane.xlu0 %832  ;;  %v1497_v39 = vld [vmem:[#allocation11 + $0x8] sm:$0xff] }
 0x4a8   : > { %v1186_v54 = vsel %vm1183_vm13, %v1185_v50, %v1181_v52  ;;  %vm1194_vm7 = vmor %vm1192_vm4, %vm1193_vm15  ;;  %3152 = vrcp.f32 %v833_v29  ;;  %1516 = vmatpush.msrb.mxu1 %v1497_v39  ;;  %v848_v42 = vand.u32 2147483648, %v833_v29  ;;  %vm842_vm13 = vweird.f32 %v833_v29  ;;  %v3121_v39 = vld [vmem:[%s4515_s19] ss:$0 sm:$0xff] }
 0x4a9   : > { %v1189_v58 = vsub.f32 1.0, %v1188_v51  ;;  %v1259_v60 = vmul.f32 %v1227_v56, %v1186_v54  ;;  %3154 = vrcp.f32 %v836_v32  ;;  %v846_v45 = vand.u32 2147483647, %v833_v29 }
 0x4aa   : > { %1517 = vmatpush.msrb.mxu1 %v1496_v40  ;;  %v849_v47 = vor.u32 1.1754944e-38, %v848_v42  ;;  %v860_v54 = vand.u32 2147483647, %v836_v32  ;;  %v3122_v40 = vld [vmem:[%s4516_s12] ss:$0 sm:$0xff] }
 0x4ab   : > { %v1190_v63 = vmul.f32 %v3151_v49, %v1189_v58  ;;  %1263 = vrot.lane.b32.xlu1 %v1259_v60, %s3592_s2  ;;  %2882 = vmatmul.msk.f32.vlgmr.msrb.gmra.mxu1 %vm685_vm0, %v3875_v2  ;;  %vm847_vm15 = vcmp.eq.f32.partialorder %v846_v45, 8.507059e+37  ;;  %v863_v58 = vor.u32 1.1754944e-38, %v862_v53 }
 0x4ac   : > { %vm861_vm5 = vcmp.eq.f32.partialorder %v860_v54, 8.507059e+37 }
 0x4ad   : > { %v1191_v10 = vadd.f32 %v3151_v49, %v1190_v63 }
 0x4ae   : > { %v3153_v31 = vpop.eup %3152 }
 0x4af   : > { %v1195_v15 = vsel %vm1194_vm7, %v3151_v49, %v1191_v10  ;;  %v838_v35 = vmul.f32 %v3153_v31, %v833_v29  ;;  %v3155_v37 = vpop.eup %3154  ;;  %vm843_vm12 = vweird.f32 %v3153_v31  ;;  %vm1462_vm7 = vcmask 261120  }
 0x4b0   : > { %v1200_v18 = vsel %vm1197_vm9, %v1199_v11, %v1195_v15  ;;  %v852_v38 = vmul.f32 %v3155_v37, %v836_v32  ;;  %vm844_vm14 = vmor %vm842_vm13, %vm843_vm12  ;;  %vm857_vm2 = vweird.f32 %v3155_v37  ;;  %v1534_v15 = vld [vmem:[#allocation13 + $0x18] sm:$0xff] }
 0x4b1   : > { %v1260_v20 = vmul.f32 %v1256_v61, %v1200_v18  ;;  %v839_v36 = vsub.f32 1.0, %v838_v35  ;;  %vm858_vm4 = vmor %vm856_vm3, %vm857_vm2  ;;  %1557 = vmatpush.msrb.mxu2 %v1534_v15  ;;  %v1570_v18 = vld [vmem:[#allocation14 + $0x10] sm:$0xff] }
 0x4b2   : > { %v1432_v22 = vpop.f32.mrf.mxu3  ;;  %v853_v44 = vsub.f32 1.0, %v852_v38  ;;  %1589 = vmatpush.msrb.mxu3 %v1570_v18 }
 0x4b3   : > { %v1436_v43 = vmul.f32 %v1432_v22, %v1376_v21  ;;  %v1403_v25 = vpop.f32.mrf.mxu2  ;;  %1265 = vrot.lane.b32.xlu1 %v1260_v20, %s3592_s2  ;;  %v840_v30 = vmul.f32 %v3153_v31, %v839_v36  ;;  %2883 = vmatmul.msk.f32.gmra.mxu1 %vm685_vm0, %v3885_v6  ;;  %v1569_v20 = vld [vmem:[#allocation14 + $0x8] sm:$0xff] }
 0x4b4   : > { %v1435_v26 = vmul.f32 %v1403_v25, %v1362_v24  ;;  %v854_v23 = vmul.f32 %v3155_v37, %v853_v44  ;;  %1558 = vmatpush.msrb.mxu2 %v1533_v17  ;;  %1590 = vmatpush.msrb.mxu3 %v1569_v20  ;;  %v3120_v21 = vld [vmem:[%s4475_s9] ss:$0 sm:$0xff] }
 0x4b5   : > { %1441 = vrot.lane.b32.xlu0 %v1436_v43, %s3593_s16  ;;  %v841_v41 = vadd.f32 %v3153_v31, %v840_v30 }
 0x4b6   : > { %1439 = vrot.lane.b32.xlu2 %v1435_v26, %s3593_s16  ;;  %v855_v51 = vadd.f32 %v3155_v37, %v854_v23  ;;  %1559 = vmatpush.msrb.mxu2 %v1532_v19  ;;  %v3119_v26 = vld [vmem:[%s4473_s7] ss:$0 sm:$0xff] }
 0x4b7   : > { %v845_v46 = vsel %vm844_vm14, %v3153_v31, %v841_v41 }
 0x4b8   : > { %v850_v49 = vsel %vm847_vm15, %v849_v47, %v845_v46  ;;  %v859_v56 = vsel %vm858_vm4, %v3155_v37, %v855_v51 }
 0x4b9   : > { %v911_v52 = vmul.f32 %v3973_v59, %v850_v49  ;;  %v864_v62 = vsel %vm861_vm5, %v863_v58, %v859_v56 }
 0x4ba   : > { %v1088_v50 = vpop.permute.xlu0 %1087  ;;  %v912_v3 = vmul.f32 %v3966_v55, %v864_v62 }
 0x4bb   : > { %v913_v2 = vadd.f32 %v911_v52, %v3904_v13  ;;  %v1093_v57 = vadd.f32 %v1088_v50, %v3904_v13  ;;  %2884 = vmatmul.msk.f32.gmra.mxu1 %vm685_vm0, %v3877_v5 }
 0x4bc   : > { %v914_v8 = vadd.f32 %v912_v3, %v3904_v13 }
 0x4bd   : > { %v1447_v59 = vsel %vm763_vm1, %v913_v2, %v1093_v57 }
 0x4c2   : > { %v1090_v6 = vpop.permute.xlu0 %1089 }
 0x4c3   : > { %v1094_v48 = vadd.f32 %v1090_v6, %v3904_v13  ;;  %2885 = vmatmul.msk.f32.gmra.mxu1 %vm685_vm0, %v3889_v7  ;;  %v1531_v7 = vld [vmem:[#allocation13] sm:$0xff] }
 0x4c4   : > { %1560 = vmatpush.msrb.mxu2 %v1531_v7 }
 0x4c5   : > { %v1448_v11 = vsel %vm763_vm1, %v914_v8, %v1094_v48 }
 0x510   : > { %v1440_v60 = vpop.permute.xlu2 %1439 }
 0x511   : > { %v1445_v0 = vadd.f32 %v1440_v60, %v3904_v13 }
 0x51d   : > { %v1264_v61 = vpop.permute.xlu1 %1263 }
 0x51e   : > { %v1269_v63 = vadd.f32 %v1264_v61, %v3904_v13 }
 0x520   : > { %v1449_v1 = vsel %vm685_vm0, %v1447_v59, %v1269_v63 }
 0x521   : > { %v1452_v4 = vsel %vm1451_vm6, %v1449_v1, %v1445_v0 }
 0x522   : > { %2880 = vmatmul.msk.f32.vlgmr.msra.gmra.mxu0 %vm1462_vm7, %v1452_v4 }
 0x525   : > { %v1266_v9 = vpop.permute.xlu1 %1265 }
 0x526   : > { %v1270_v10 = vadd.f32 %v1266_v9, %v3904_v13 }
 0x527   : > { %v1442_v12 = vpop.permute.xlu0 %1441 }
 0x528   : > { %v1446_v5 = vadd.f32 %v1442_v12, %v3904_v13  ;;  %v1450_v55 = vsel %vm685_vm0, %v1448_v11, %v1270_v10  ;;  %v1568_v13 = vld [vmem:[#allocation14] sm:$0xff]  ;;  %v1519_v22 = vpop.f32.mrf.mxu1 }
 0x529   : > { %1591 = vmatpush.msrb.mxu3 %v1568_v13  ;;  %v4080_v43 = vadd.f32 %v3120_v21, %v1519_v22 }
 0x52a   : > { %v1453_v14 = vsel %vm1451_vm6, %v1450_v55, %v1446_v5 }
 0x52b   : > { %2881 = vmatmul.msk.f32.gmra.mxu0 %vm1462_vm7, %v1453_v14  ;;  %1821 = vrot.lane.b32.xlu1 %v4080_v43, %s3588_s11 }
 0x530   : > { %v1522_v24 = vpop.f32.mrf.mxu1 }
 0x531   : > { %v4084_v25 = vadd.f32 %v3120_v21, %v1522_v24 }
 0x533   : > { %1823 = vrot.lane.b32.xlu0 %v4084_v25, %s3588_s11 }
 0x538   : > { %v1525_v28 = vpop.f32.mrf.mxu1 }
 0x539   : > { %v4091_v31 = vadd.f32 %v3120_v21, %v1525_v28 }
 0x53b   : > { %1856 = vrot.lane.b32.xlu0 %v4091_v31, %s3588_s11 }
 0x540   : > { %v1528_v30 = vpop.f32.mrf.mxu1 }
 0x541   : > { %v4105_v38 = vadd.f32 %v3120_v21, %v1528_v30 }
 0x543   : > { %2075 = vrot.lane.b32.xlu0 %v4084_v25, %s3589_s15 }
 0x54b   : > { %2108 = vrot.lane.b32.xlu0 %v4091_v31, %s3589_s15 }
 0x553   : > { %2325 = vrot.lane.b32.xlu0 %v4084_v25, %s3590_s18 }
 0x55b   : > { %2360 = vrot.lane.b32.xlu0 %v4105_v38, %s3590_s18 }
 0x59d   : > { %v1822_v52 = vpop.permute.xlu1 %1821 }
 0x59f   : > { %v1486_v27 = vpop.f32.mrf.mxu0 }
 0x5a0   : > { %v1487_v29 = vadd.f32 %v3119_v26, %v1486_v27 }
 0x5a2   : > { %v1492_v32 = vmax.f32 %v1487_v29, 0.0 }
 0x5a4   : > { %v1494_v33 = vadd.f32 %v1492_v32, %v1452_v4 }
 0x5a5   : > { %v1824_v50 = vpop.permute.xlu0 %1823 }
 0x5a6   : > { %2886 = vmatmul.msk.f32.vlgmr.msrb.gmra.mxu2 %vm1462_vm7, %v1494_v33  ;;  %2888 = vmatmul.msk.f32.vlgmr.msrb.gmra.mxu3 %vm1462_vm7, %v1494_v33 }
 0x5a8   : > { %v1489_v34 = vpop.f32.mrf.mxu0 }
 0x5a9   : > { %v1490_v35 = vadd.f32 %v3119_v26, %v1489_v34 }
 0x5ab   : > { %v1493_v36 = vmax.f32 %v1490_v35, 0.0 }
 0x5ad   : > { %v1495_v37 = vadd.f32 %v1493_v36, %v1453_v14  ;;  %v1857_v54 = vpop.permute.xlu0 %1856 }
 0x5af   : > { %2887 = vmatmul.msk.f32.gmra.mxu2 %vm1462_vm7, %v1495_v37  ;;  %2889 = vmatmul.msk.f32.gmra.mxu3 %vm1462_vm7, %v1495_v37 }
 0x5b5   : > { %v2076_v58 = vpop.permute.xlu0 %2075 }
 0x5bd   : > { %v2109_v63 = vpop.permute.xlu0 %2108 }
 0x5c5   : > { %v2326_v48 = vpop.permute.xlu0 %2325 }
 0x5cd   : > { %v2361_v5 = vpop.permute.xlu0 %2360 }
 0x629   : > { %v1562_v41 = vpop.f32.mrf.mxu2  ;;  %v1593_v42 = vpop.f32.mrf.mxu3 }
 0x62a   : > { %v1563_v44 = vadd.f32 %v3121_v39, %v1562_v41  ;;  %v4115_v45 = vadd.f32 %v3122_v40, %v1593_v42 }
 0x62c   : > { %1776 = vmatpush.msra.mxu3 %v4115_v45  ;;  %2077 = vrot.lane.b32.xlu1 %v1563_v44, %s3589_s15 }
 0x62d   : > { %1825 = vrot.lane.b32.xlu2 %v1563_v44, %s3588_s11  ;;  %2890 = vmatpush.xpose.msk.msrb.mxu0 %vm763_vm1, %v1563_v44 }
 0x630   : > { %2891 = vmatmul.msk.f32.vlgmr.msrb.gmra.mxu0 %vm763_vm1, %v4080_v43 }
 0x632   : > { %v1565_v46 = vpop.f32.mrf.mxu2  ;;  %v1596_v47 = vpop.f32.mrf.mxu3 }
 0x633   : > { %v1566_v23 = vadd.f32 %v3121_v39, %v1565_v46  ;;  %v4123_v49 = vadd.f32 %v3122_v40, %v1596_v47 }
 0x634   : > { %1858 = vrot.lane.b32.xlu1 %v4105_v38, %s3588_s11 }
 0x635   : > { %1805 = vmatpush.msra.mxu0 %v4123_v49  ;;  %1860 = vrot.lane.b32.xlu2 %v1566_v23, %s3588_s11  ;;  %v3112_v19 = vpack.i.bf16 %v4123_v49, %v4115_v45 }
 0x636   : > { %2893 = vmatpush.xpose.msk.msra.mxu2 %vm763_vm1, %v1566_v23 }
 0x638   : > { %2892 = vmatmul.msk.f32.gmra.mxu0 %vm763_vm1, %v4084_v25 }
 0x639   : > { %2894 = vmatmul.msk.f32.vlgmr.msra.gmra.mxu2 %vm763_vm1, %v4091_v31 }
 0x63c   : > { %2327 = vrot.lane.b32.xlu1 %v1563_v44, %s3590_s18 }
 0x63d   : > { %2073 = vrot.lane.b32.xlu2 %v4080_v43, %s3589_s15 }
 0x641   : > { %2895 = vmatmul.msk.f32.gmra.mxu2 %vm763_vm1, %v4105_v38 }
 0x644   : > { %2110 = vrot.lane.b32.xlu1 %v4105_v38, %s3589_s15 }
 0x645   : > { %2112 = vrot.lane.b32.xlu2 %v1566_v23, %s3589_s15 }
 0x64c   : > { %2358 = vrot.lane.b32.xlu1 %v4091_v31, %s3590_s18 }
 0x64d   : > { %2323 = vrot.lane.b32.xlu2 %v4080_v43, %s3590_s18 }
 0x655   : > { %2362 = vrot.lane.b32.xlu2 %v1566_v23, %s3590_s18 }
 0x687   : > { %v1826_v51 = vpop.permute.xlu2 %1825 }
 0x688   : > { %2900 = vmatpush.xpose.msk.msra.mxu1 %vm763_vm1, %v1826_v51 }
 0x68b   : > { %2901 = vmatmul.msk.f32.vlgmr.msra.gmra.mxu1 %vm763_vm1, %v1822_v52 }
 0x68f   : > { %v1861_v53 = vpop.permute.xlu2 %1860 }
 0x690   : > { %2903 = vmatpush.xpose.msk.msrb.mxu2 %vm763_vm1, %v1861_v53 }
 0x693   : > { %2902 = vmatmul.msk.f32.gmra.mxu1 %vm763_vm1, %v1824_v50  ;;  %2904 = vmatmul.msk.f32.vlgmr.msrb.gmra.mxu2 %vm763_vm1, %v1857_v54 }
 0x697   : > { %v2074_v56 = vpop.permute.xlu2 %2073 }
 0x69e   : > { %v2078_v2 = vpop.permute.xlu1 %2077 }
 0x69f   : > { %v2113_v57 = vpop.permute.xlu2 %2112  ;;  %2910 = vmatpush.xpose.msk.msrb.mxu1 %vm763_vm1, %v2078_v2 }
 0x6a0   : > { %2913 = vmatpush.xpose.msk.msra.mxu2 %vm763_vm1, %v2113_v57 }
 0x6a2   : > { %2911 = vmatmul.msk.f32.vlgmr.msrb.gmra.mxu1 %vm763_vm1, %v2074_v56 }
 0x6a6   : > { %v1859_v60 = vpop.permute.xlu1 %1858 }
 0x6a7   : > { %v2324_v61 = vpop.permute.xlu2 %2323  ;;  %2905 = vmatmul.msk.f32.gmra.mxu2 %vm763_vm1, %v1859_v60 }
 0x6aa   : > { %2912 = vmatmul.msk.f32.gmra.mxu1 %vm763_vm1, %v2076_v58 }
 0x6ad   : > { %v1625_v62 = vpop.f32.mrf.mxu0 }
 0x6ae   : > { %v1663_v59 = vsel %vm763_vm1, %v1625_v62, -inf  ;;  %v2328_v6 = vpop.permute.xlu1 %2327 }
 0x6af   : > { %1664 = vmax.xlane.f32.xlu2 %v1663_v59  ;;  %v2363_v0 = vpop.permute.xlu2 %2362  ;;  %2914 = vmatmul.msk.f32.vlgmr.msra.gmra.mxu2 %vm763_vm1, %v2109_v63 }
 0x6b0   : > { %2920 = vmatpush.xpose.msk.msra.mxu1 %vm763_vm1, %v2328_v6  ;;  %2923 = vmatpush.xpose.msk.msrb.mxu2 %vm763_vm1, %v2363_v0 }
 0x6b3   : > { %2921 = vmatmul.msk.f32.vlgmr.msra.gmra.mxu1 %vm763_vm1, %v2324_v61 }
 0x6b5   : > { %v1628_v1 = vpop.f32.mrf.mxu0 }
 0x6b6   : > { %v1666_v3 = vsel %vm763_vm1, %v1628_v1, -inf  ;;  %v2111_v4 = vpop.permute.xlu1 %2110 }
 0x6b7   : > { %1667 = vmax.xlane.f32.xlu1 %v1666_v3  ;;  %2915 = vmatmul.msk.f32.gmra.mxu2 %vm763_vm1, %v2111_v4 }
 0x6bb   : > { %2922 = vmatmul.msk.f32.gmra.mxu1 %vm763_vm1, %v2326_v48 }
 0x6bc   : > { %v1657_v8 = vpop.f32.mrf.mxu2 }
 0x6bd   : > { %v1669_v9 = vsel %vm763_vm1, %v1657_v8, -inf }
 0x6be   : > { %1670 = vmax.xlane.f32.xlu2 %v1669_v9  ;;  %v2359_v10 = vpop.permute.xlu1 %2358 }
 0x6bf   : > { %2924 = vmatmul.msk.f32.vlgmr.msrb.gmra.mxu2 %vm763_vm1, %v2359_v10 }
 0x6c4   : > { %v1660_v11 = vpop.f32.mrf.mxu2 }
 0x6c5   : > { %v1672_v12 = vsel %vm763_vm1, %v1660_v11, -inf }
 0x6c6   : > { %1673 = vmax.xlane.f32.xlu2 %v1672_v12 }
 0x6c7   : > { %2925 = vmatmul.msk.f32.gmra.mxu2 %vm763_vm1, %v2361_v5 }
 0x6de   : > { %2235 = vrot.lane.b32.xlu2 %v4115_v45, %s3589_s15 }
 0x6e6   : > { %2485 = vrot.lane.b32.xlu2 %v4115_v45, %s3590_s18 }
 0x708   : > { %v4173_v55 = vpop.f32.mrf.mxu1 }
 0x709   : > { %v1891_v14 = vsel %vm763_vm1, %v4173_v55, -inf }
 0x70a   : > { %1892 = vmax.xlane.f32.xlu0 %v1891_v14 }
 0x710   : > { %v4177_v15 = vpop.f32.mrf.mxu1 }
 0x711   : > { %v1894_v16 = vsel %vm763_vm1, %v4177_v15, -inf }
 0x712   : > { %1895 = vmax.xlane.f32.xlu1 %v1894_v16 }
 0x716   : > { %v4181_v17 = vpop.f32.mrf.mxu2 }
 0x717   : > { %v1897_v18 = vsel %vm763_vm1, %v4181_v17, -inf }
 0x718   : > { %1898 = vmax.xlane.f32.xlu2 %v1897_v18 }
 0x71e   : > { %3113 = vrot.lane.b32.xlu0 %v3112_v19, %s3588_s11 }
 0x71f   : > { %v4188_v20 = vpop.f32.mrf.mxu1 }
 0x720   : > { %v2143_v7 = vsel %vm763_vm1, %v4188_v20, -inf }
 0x721   : > { %2144 = vmax.xlane.f32.xlu1 %v2143_v7 }
 0x722   : > { %v1665_v13 = vpop.xlane.xlu2 %1664 }
 0x723   : > { %v1675_v21 = vsub.f32 %v1625_v62, %v1665_v13 }
 0x725   : > { %v1679_v22 = vmul.f32 1.442695, %v1675_v21 }
 0x727   : > { %3156 = vpow2.f32 %v1679_v22  ;;  %v4192_v24 = vpop.f32.mrf.mxu1 }
 0x728   : > { %v2146_v26 = vsel %vm763_vm1, %v4192_v24, -inf }
 0x729   : > { %2147 = vmax.xlane.f32.xlu1 %v2146_v26 }
 0x72a   : > { %v1668_v27 = vpop.xlane.xlu1 %1667  ;;  %v4196_v28 = vpop.f32.mrf.mxu2 }
 0x72b   : > { %v1676_v29 = vsub.f32 %v1628_v1, %v1668_v27  ;;  %v1900_v52 = vsel %vm763_vm1, %v4196_v28, -inf }
 0x72d   : > { %v3157_v32 = vpop.eup %3156  ;;  %v1681_v33 = vmul.f32 1.442695, %v1676_v29 }
 0x72e   : > { %2896 = vmatmul.msk.f32.vlgmr.msra.gmra.mxu3 %vm763_vm1, %v3157_v32  ;;  %v1687_v60 = vsel %vm763_vm1, %v3157_v32, 0.0 }
 0x72f   : > { %3158 = vpow2.f32 %v1681_v33 }
 0x730   : > { %2267 = vrot.lane.b32.xlu2 %v4123_v49, %s3589_s15  ;;  %v4205_v40 = vpop.f32.mrf.mxu1  ;;  %s3510_s15 = scalar_lea.hbm %s4520_s29, 64 }
 0x731   : > { %v1671_v34 = vpop.xlane.xlu2 %1670  ;;  %v2393_v44 = vsel %vm763_vm1, %v4205_v40, -inf }
 0x732   : > { %v1677_v35 = vsub.f32 %v1657_v8, %v1671_v34  ;;  %v4201_v36 = vpop.f32.mrf.mxu2 }
 0x733   : > { %v2149_v37 = vsel %vm763_vm1, %v4201_v36, -inf }
 0x734   : > { %v1683_v30 = vmul.f32 1.442695, %v1677_v35  ;;  %2150 = vmax.xlane.f32.xlu1 %v2149_v37 }
 0x735   : > { %v3159_v39 = vpop.eup %3158 }
 0x736   : > { %3160 = vpow2.f32 %v1683_v30  ;;  %2897 = vmatmul.msk.f32.gmra.mxu3 %vm763_vm1, %v3159_v39  ;;  %v1690_v1 = vsel %vm763_vm1, %v3159_v39, 0.0 }
 0x738   : > { %v4211_v47 = vpop.f32.mrf.mxu1 }
 0x739   : > { %v1674_v41 = vpop.xlane.xlu2 %1673  ;;  %v2396_v50 = vsel %vm763_vm1, %v4211_v47, -inf }
 0x73a   : > { %v1678_v42 = vsub.f32 %v1660_v11, %v1674_v41  ;;  %v4213_v23 = vpop.f32.mrf.mxu2 }
 0x73b   : > { %v2152_v53 = vsel %vm763_vm1, %v4213_v23, -inf }
 0x73c   : > { %v3161_v45 = vpop.eup %3160  ;;  %v1685_v46 = vmul.f32 1.442695, %v1678_v42  ;;  %2394 = vmax.xlane.f32.xlu1 %v2393_v44 }
 0x73d   : > { %2898 = vmatmul.msk.f32.vlgmr.msra.gmra.mxu0 %vm763_vm1, %v3161_v45  ;;  %v1693_v58 = vsel %vm763_vm1, %v3161_v45, 0.0 }
 0x73e   : > { %3162 = vpow2.f32 %v1685_v46 }
 0x741   : > { %v2236_v61 = vpop.permute.xlu2 %2235 }
 0x742   : > { %v4225_v54 = vpop.f32.mrf.mxu2 }
 0x743   : > { %v2399_v56 = vsel %vm763_vm1, %v4225_v54, -inf }
 0x744   : > { %v4217_v51 = vpop.eup %3162  ;;  %2397 = vmax.xlane.f32.xlu1 %v2396_v50 }
 0x745   : > { %2899 = vmatmul.msk.f32.gmra.mxu0 %vm763_vm1, %v4217_v51 }
 0x748   : > { %1901 = vmax.xlane.f32.xlu0 %v1900_v52 }
 0x749   : > { %v2486_v6 = vpop.permute.xlu2 %2485 }
 0x74a   : > { %v4229_v2 = vpop.f32.mrf.mxu2 }
 0x74b   : > { %v2402_v57 = vsel %vm763_vm1, %v4229_v2, -inf }
 0x74c   : > { %2153 = vmax.xlane.f32.xlu1 %v2152_v53 }
 0x754   : > { %2400 = vmax.xlane.f32.xlu1 %v2399_v56 }
 0x759   : > { %2403 = vmax.xlane.f32.xlu2 %v2402_v57 }
 0x75c   : > { %2517 = vrot.lane.b32.xlu0 %v4123_v49, %s3590_s18  ;;  %1694 = vadd.xlane.f32.xlu1 %v1693_v58  ;;  %s4519_s18 = sld [smem:[#allocation34_spill]] }
 0x761   : > { %1688 = vadd.xlane.f32.xlu2 %v1687_v60 }
 0x77d   : > { %v1893_v62 = vpop.xlane.xlu0 %1892 }
 0x77e   : > { %v1903_v63 = vsub.f32 %v4173_v55, %v1893_v62 }
 0x780   : > { %v1907_v59 = vmul.f32 1.442695, %v1903_v63 }
 0x782   : > { %3164 = vpow2.f32 %v1907_v59 }
 0x785   : > { %v1896_v0 = vpop.xlane.xlu1 %1895 }
 0x786   : > { %v1904_v3 = vsub.f32 %v4177_v15, %v1896_v0  ;;  %1691 = vadd.xlane.f32.xlu0 %v1690_v1 }
 0x788   : > { %v3165_v4 = vpop.eup %3164  ;;  %v1909_v48 = vmul.f32 1.442695, %v1904_v3 }
 0x789   : > { %v1915_v49 = vsel %vm763_vm1, %v3165_v4, 0.0 }
 0x78a   : > { %3166 = vpow2.f32 %v1909_v48  ;;  %1916 = vadd.xlane.f32.xlu1 %v1915_v49 }
 0x78b   : > { %v1899_v8 = vpop.xlane.xlu2 %1898 }
 0x78c   : > { %v1905_v9 = vsub.f32 %v4181_v17, %v1899_v8 }
 0x78e   : > { %v1911_v10 = vmul.f32 1.442695, %v1905_v9 }
 0x790   : > { %v3167_v11 = vpop.eup %3166  ;;  %3168 = vpow2.f32 %v1911_v10  ;;  %v3114_v12 = vpop.permute.xlu0 %3113 }
 0x791   : > { %v3116_v5 = vunpack.i.h.bf16 %v3114_v12  ;;  %v3115_v55 = vunpack.i.l.bf16 %v3114_v12  ;;  %v1918_v14 = vsel %vm763_vm1, %v3167_v11, 0.0 }
 0x792   : > { %1919 = vadd.xlane.f32.xlu0 %v1918_v14 }
 0x793   : > { %2008 = vmatpush.msrb.mxu3 %v3115_v55  ;;  %2041 = vmatpush.msrb.mxu0 %v3116_v5  ;;  %v2268_v15 = vpop.permute.xlu2 %2267 }
 0x794   : > { %2906 = vmatmul.msk.f32.vlgmr.msrb.gmra.mxu3 %vm763_vm1, %v3165_v4  ;;  %v2145_v16 = vpop.xlane.xlu1 %2144 }
 0x795   : > { %2291 = vmatpush.msra.mxu0 %v2268_v15  ;;  %2259 = vmatpush.msra.mxu3 %v2236_v61  ;;  %v2155_v18 = vsub.f32 %v4188_v20, %v2145_v16 }
 0x796   : > { %v3169_v17 = vpop.eup %3168 }
 0x797   : > { %2509 = vmatpush.msrb.mxu3 %v2486_v6  ;;  %v2159_v19 = vmul.f32 1.442695, %v2155_v18  ;;  %2908 = vmatmul.msk.f32.vlgmr.msrb.gmra.mxu0 %vm763_vm1, %v3169_v17  ;;  %v1921_v7 = vsel %vm763_vm1, %v3169_v17, 0.0 }
 0x798   : > { %1922 = vadd.xlane.f32.xlu2 %v1921_v7 }
 0x799   : > { %3170 = vpow2.f32 %v2159_v19 }
 0x79c   : > { %2907 = vmatmul.msk.f32.gmra.mxu3 %vm763_vm1, %v3167_v11  ;;  %v2148_v13 = vpop.xlane.xlu1 %2147 }
 0x79d   : > { %v2156_v21 = vsub.f32 %v4192_v24, %v2148_v13 }
 0x79f   : > { %v3171_v22 = vpop.eup %3170  ;;  %v2161_v27 = vmul.f32 1.442695, %v2156_v21 }
 0x7a0   : > { %v2167_v26 = vsel %vm763_vm1, %v3171_v22, 0.0 }
 0x7a1   : > { %2168 = vadd.xlane.f32.xlu1 %v2167_v26  ;;  %3172 = vpow2.f32 %v2161_v27 }
 0x7a4   : > { %2916 = vmatmul.msk.f32.vlgmr.msra.gmra.mxu3 %vm763_vm1, %v3171_v22 }
 0x7a7   : > { %v2151_v20 = vpop.xlane.xlu1 %2150  ;;  %v3173_v29 = vpop.eup %3172 }
 0x7a8   : > { %v2157_v45 = vsub.f32 %v4201_v36, %v2151_v20  ;;  %v2170_v62 = vsel %vm763_vm1, %v3173_v29, 0.0 }
 0x7ac   : > { %2917 = vmatmul.msk.f32.gmra.mxu3 %vm763_vm1, %v3173_v29 }
 0x7af   : > { %v2395_v32 = vpop.xlane.xlu1 %2394 }
 0x7b0   : > { %v2405_v33 = vsub.f32 %v4205_v40, %v2395_v32 }
 0x7b1   : > { %v1778_v20 = vpop.f32.mrf.mxu3 }
 0x7b2   : > { %v2409_v34 = vmul.f32 1.442695, %v2405_v33 }
 0x7b4   : > { %3174 = vpow2.f32 %v2409_v34 }
 0x7b7   : > { %v2398_v35 = vpop.xlane.xlu1 %2397 }
 0x7b8   : > { %v2406_v24 = vsub.f32 %v4211_v47, %v2398_v35  ;;  %v2163_v47 = vmul.f32 1.442695, %v2157_v45 }
 0x7ba   : > { %v3175_v37 = vpop.eup %3174  ;;  %v2411_v30 = vmul.f32 1.442695, %v2406_v24  ;;  %v1807_v18 = vpop.f32.mrf.mxu0 }
 0x7bb   : > { %v1902_v39 = vpop.xlane.xlu0 %1901  ;;  %2926 = vmatmul.msk.f32.vlgmr.msrb.gmra.mxu3 %vm763_vm1, %v3175_v37 }
 0x7bc   : > { %3176 = vpow2.f32 %v2411_v30  ;;  %v1906_v41 = vsub.f32 %v4196_v28, %v1902_v39 }
 0x7be   : > { %v1913_v42 = vmul.f32 1.442695, %v1906_v41 }
 0x7bf   : > { %v2154_v44 = vpop.xlane.xlu1 %2153 }
 0x7c0   : > { %3178 = vpow2.f32 %v1913_v42  ;;  %v2158_v40 = vsub.f32 %v4213_v23, %v2154_v44 }
 0x7c2   : > { %v4258_v46 = vpop.eup %3176  ;;  %v2165_v50 = vmul.f32 1.442695, %v2158_v40 }
 0x7c3   : > { %2927 = vmatmul.msk.f32.gmra.mxu3 %vm763_vm1, %v4258_v46  ;;  %v2420_v33 = vsel %vm763_vm1, %v4258_v46, 0.0 }
 0x7c4   : > { %3180 = vpow2.f32 %v2165_v50 }
 0x7c5   : > { %3182 = vpow2.f32 %v2163_v47 }
 0x7c6   : > { %v3179_v52 = vpop.eup %3178 }
 0x7c7   : > { %2909 = vmatmul.msk.f32.gmra.mxu0 %vm763_vm1, %v3179_v52  ;;  %v1924_v28 = vsel %vm763_vm1, %v3179_v52, 0.0  ;;  %v2401_v53 = vpop.xlane.xlu1 %2400 }
 0x7c8   : > { %1925 = vadd.xlane.f32.xlu1 %v1924_v28  ;;  %v2407_v36 = vsub.f32 %v4225_v54, %v2401_v53  ;;  %v1781_v53 = vpop.f32.mrf.mxu3 }
 0x7ca   : > { %v3181_v56 = vpop.eup %3180  ;;  %v2413_v23 = vmul.f32 1.442695, %v2407_v36 }
 0x7cb   : > { %v2176_v57 = vsel %vm763_vm1, %v3181_v56, 0.0  ;;  %v3183_v60 = vpop.eup %3182 }
 0x7cc   : > { %3184 = vpow2.f32 %v2413_v23  ;;  %v2404_v58 = vpop.xlane.xlu2 %2403  ;;  %2177 = vadd.xlane.f32.xlu2 %v2176_v57  ;;  %v2173_v4 = vsel %vm763_vm1, %v3183_v60, 0.0 }
 0x7cd   : > { %v2408_v1 = vsub.f32 %v4229_v2, %v2404_v58  ;;  %v2417_v2 = vsel %vm763_vm1, %v3175_v37, 0.0 }
 0x7ce   : > { %v2518_v61 = vpop.permute.xlu0 %2517 }
 0x7cf   : > { %2918 = vmatmul.msk.f32.vlgmr.msra.gmra.mxu0 %vm763_vm1, %v3183_v60  ;;  %v1695_v63 = vpop.xlane.xlu1 %1694  ;;  %v2415_v9 = vmul.f32 1.442695, %v2408_v1 }
 0x7d0   : > { %2541 = vmatpush.msrb.mxu0 %v2518_v61  ;;  %2171 = vadd.xlane.f32.xlu1 %v2170_v62  ;;  %3186 = vrcp.f32 %v1695_v63  ;;  %v1738_v49 = vand.u32 2147483648, %v1695_v63  ;;  %v1736_v11 = vand.u32 2147483647, %v1695_v63  ;;  %vm1732_vm9 = vweird.f32 %v1695_v63 }
 0x7d2   : > { %v3185_v59 = vpop.eup %3184  ;;  %v1739_v55 = vor.u32 1.1754944e-38, %v1738_v49  ;;  %vm1737_vm11 = vcmp.eq.f32.partialorder %v1736_v11, 8.507059e+37 }
 0x7d3   : > { %v2423_v54 = vsel %vm763_vm1, %v3185_v59, 0.0 }
 0x7d4   : > { %v1689_v6 = vpop.xlane.xlu2 %1688  ;;  %2424 = vadd.xlane.f32.xlu2 %v2423_v54 }
 0x7d5   : > { %3188 = vrcp.f32 %v1689_v6  ;;  %v1710_v16 = vand.u32 2147483648, %v1689_v6  ;;  %v1708_v7 = vand.u32 2147483647, %v1689_v6  ;;  %vm1704_vm13 = vweird.f32 %v1689_v6 }
 0x7d6   : > { %v3187_v0 = vpop.eup %3186  ;;  %3190 = vpow2.f32 %v2415_v9 }
 0x7d7   : > { %v1728_v3 = vmul.f32 %v3187_v0, %v1695_v63  ;;  %2919 = vmatmul.msk.f32.gmra.mxu0 %vm763_vm1, %v3181_v56  ;;  %vm1733_vm8 = vweird.f32 %v3187_v0  ;;  %v1711_v22 = vor.u32 1.1754944e-38, %v1710_v16  ;;  %vm1709_vm15 = vcmp.eq.f32.partialorder %v1708_v7, 8.507059e+37 }
 0x7d8   : > { %2174 = vadd.xlane.f32.xlu1 %v2173_v4  ;;  %vm1734_vm10 = vmor %vm1732_vm9, %vm1733_vm8 }
 0x7d9   : > { %v1729_v48 = vsub.f32 1.0, %v1728_v3 }
 0x7db   : > { %v3189_v8 = vpop.eup %3188  ;;  %v1730_v10 = vmul.f32 %v3187_v0, %v1729_v48 }
 0x7dc   : > { %v1700_v12 = vmul.f32 %v3189_v8, %v1689_v6  ;;  %vm1705_vm12 = vweird.f32 %v3189_v8  ;;  %v3191_v27 = vpop.eup %3190 }
 0x7dd   : > { %v1731_v5 = vadd.f32 %v3187_v0, %v1730_v10  ;;  %vm1706_vm14 = vmor %vm1704_vm13, %vm1705_vm12  ;;  %v2426_v34 = vsel %vm763_vm1, %v3191_v27, 0.0 }
 0x7de   : > { %v1701_v14 = vsub.f32 1.0, %v1700_v12 }
 0x7df   : > { %v1735_v15 = vsel %vm1734_vm10, %v3187_v0, %v1731_v5  ;;  %2928 = vmatmul.msk.f32.vlgmr.msrb.gmra.mxu0 %vm763_vm1, %v3185_v59 }
 0x7e0   : > { %v1740_v17 = vsel %vm1737_vm11, %v1739_v55, %v1735_v15  ;;  %v1702_v19 = vmul.f32 %v3189_v8, %v1701_v14  ;;  %2418 = vadd.xlane.f32.xlu1 %v2417_v2 }
 0x7e1   : > { %v4274_v13 = vmul.f32 %v1807_v18, %v1740_v17 }
 0x7e2   : > { %v1703_v21 = vadd.f32 %v3189_v8, %v1702_v19 }
 0x7e4   : > { %v1707_v26 = vsel %vm1706_vm14, %v3189_v8, %v1703_v21 }
 0x7e5   : > { %v1712_v29 = vsel %vm1709_vm15, %v1711_v22, %v1707_v26 }
 0x7e6   : > { %v4276_v32 = vmul.f32 %v1778_v20, %v1712_v29  ;;  %v4289_v20 = vpop.f32.mrf.mxu0 }
 0x7e7   : > { %2929 = vmatmul.msk.f32.gmra.mxu0 %vm763_vm1, %v3191_v27 }
 0x7e8   : > { %2421 = vadd.xlane.f32.xlu1 %v2420_v33 }
 0x7f0   : > { %2427 = vadd.xlane.f32.xlu1 %v2426_v34 }
 0x7f9   : > { %v1692_v35 = vpop.xlane.xlu0 %1691 }
 0x7fa   : > { %3192 = vrcp.f32 %v1692_v35  ;;  %v1724_v42 = vand.u32 2147483648, %v1692_v35  ;;  %v1722_v45 = vand.u32 2147483647, %v1692_v35  ;;  %vm1718_vm3 = vweird.f32 %v1692_v35 }
 0x7fc   : > { %v1725_v47 = vor.u32 1.1754944e-38, %v1724_v42  ;;  %vm1723_vm5 = vcmp.eq.f32.partialorder %v1722_v45, 8.507059e+37 }
 0x7fd   : > { %v1917_v24 = vpop.xlane.xlu1 %1916 }
 0x7fe   : > { %3194 = vrcp.f32 %v1917_v24  ;;  %v1938_v62 = vand.u32 2147483648, %v1917_v24  ;;  %vm1932_vm9 = vweird.f32 %v1917_v24  ;;  %v1936_v63 = vand.u32 2147483647, %v1917_v24 }
 0x800   : > { %v3193_v37 = vpop.eup %3192  ;;  %v1939_v0 = vor.u32 1.1754944e-38, %v1938_v62  ;;  %vm1937_vm11 = vcmp.eq.f32.partialorder %v1936_v63, 8.507059e+37 }
 0x801   : > { %v1714_v30 = vmul.f32 %v3193_v37, %v1692_v35  ;;  %vm1719_vm2 = vweird.f32 %v3193_v37 }
 0x802   : > { %vm1720_vm4 = vmor %vm1718_vm3, %vm1719_vm2 }
 0x803   : > { %v1715_v39 = vsub.f32 1.0, %v1714_v30 }
 0x804   : > { %v3195_v41 = vpop.eup %3194 }
 0x805   : > { %v1716_v44 = vmul.f32 %v3193_v37, %v1715_v39  ;;  %v1928_v40 = vmul.f32 %v3195_v41, %v1917_v24  ;;  %v1920_v50 = vpop.xlane.xlu0 %1919  ;;  %vm1933_vm8 = vweird.f32 %v3195_v41 }
 0x806   : > { %3196 = vrcp.f32 %v1920_v50  ;;  %vm1934_vm10 = vmor %vm1932_vm9, %vm1933_vm8  ;;  %v1952_v49 = vand.u32 2147483648, %v1920_v50  ;;  %vm1946_vm13 = vweird.f32 %v1920_v50  ;;  %v1950_v8 = vand.u32 2147483647, %v1920_v50 }
 0x807   : > { %v1717_v46 = vadd.f32 %v3193_v37, %v1716_v44  ;;  %v1929_v52 = vsub.f32 1.0, %v1928_v40 }
 0x808   : > { %v1953_v12 = vor.u32 1.1754944e-38, %v1952_v49  ;;  %vm1951_vm15 = vcmp.eq.f32.partialorder %v1950_v8, 8.507059e+37 }
 0x809   : > { %v1721_v28 = vsel %vm1720_vm4, %v3193_v37, %v1717_v46  ;;  %v1930_v57 = vmul.f32 %v3195_v41, %v1929_v52 }
 0x80a   : > { %v1726_v36 = vsel %vm1723_vm5, %v1725_v47, %v1721_v28 }
 0x80b   : > { %v4282_v56 = vmul.f32 %v1781_v53, %v1726_v36  ;;  %v1931_v61 = vadd.f32 %v3195_v41, %v1930_v57  ;;  %v4291_v33 = vpop.xlane.xlu2 %1922  ;;  %v1696_v53 = vsel %vm763_vm1, %v4217_v51, 0.0 }
 0x80c   : > { %v3197_v23 = vpop.eup %3196 }
 0x80d   : > { %v1942_v58 = vmul.f32 %v3197_v23, %v1920_v50  ;;  %v1935_v54 = vsel %vm1934_vm10, %v3195_v41, %v1931_v61  ;;  %vm1947_vm12 = vweird.f32 %v3197_v23 }
 0x80e   : > { %v1940_v1 = vsel %vm1937_vm11, %v1939_v0, %v1935_v54  ;;  %vm1948_vm14 = vmor %vm1946_vm13, %vm1947_vm12 }
 0x80f   : > { %v1943_v60 = vsub.f32 1.0, %v1942_v58 }
 0x811   : > { %v1944_v6 = vmul.f32 %v3197_v23, %v1943_v60 }
 0x813   : > { %v1945_v48 = vadd.f32 %v3197_v23, %v1944_v6 }
 0x814   : > { %v2169_v59 = vpop.xlane.xlu1 %2168  ;;  %v4293_v35 = vpop.f32.mrf.mxu0 }
 0x815   : > { %3198 = vrcp.f32 %v2169_v59  ;;  %v1949_v11 = vsel %vm1948_vm14, %v3197_v23, %v1945_v48  ;;  %v2190_v2 = vand.u32 2147483648, %v2169_v59  ;;  %v2188_v18 = vand.u32 2147483647, %v2169_v59 }
 0x816   : > { %v1954_v55 = vsel %vm1951_vm15, %v1953_v12, %v1949_v11  ;;  %vm2184_vm3 = vweird.f32 %v2169_v59 }
 0x817   : > { %v2010_v3 = vpop.f32.mrf.mxu3  ;;  %v2191_v19 = vor.u32 1.1754944e-38, %v2190_v2  ;;  %vm2189_vm5 = vcmp.eq.f32.partialorder %v2188_v18, 8.507059e+37 }
 0x818   : > { %v2049_v4 = vmul.f32 %v2010_v3, %v1940_v1 }
 0x81a   : > { %2057 = vrot.lane.b32.xlu2 %v2049_v4, %s3591_s25 }
 0x81b   : > { %v3199_v9 = vpop.eup %3198 }
 0x81c   : > { %v2180_v10 = vmul.f32 %v3199_v9, %v2169_v59  ;;  %vm2185_vm2 = vweird.f32 %v3199_v9 }
 0x81d   : > { %vm2186_vm4 = vmor %vm2184_vm3, %vm2185_vm2 }
 0x81e   : > { %v2181_v5 = vsub.f32 1.0, %v2180_v10 }
 0x81f   : > { %v2013_v14 = vpop.f32.mrf.mxu3 }
 0x820   : > { %v2050_v15 = vmul.f32 %v2013_v14, %v1954_v55  ;;  %v2182_v16 = vmul.f32 %v3199_v9, %v2181_v5 }
 0x822   : > { %2059 = vrot.lane.b32.xlu2 %v2050_v15, %s3591_s25  ;;  %v2183_v17 = vadd.f32 %v3199_v9, %v2182_v16  ;;  %v1966_v16 = vand.u32 2147483648, %v4291_v33 }
 0x824   : > { %v2187_v7 = vsel %vm2186_vm4, %v3199_v9, %v2183_v17 }
 0x825   : > { %v2192_v21 = vsel %vm2189_vm5, %v2191_v19, %v2187_v7 }
 0x827   : > { %v2261_v22 = vpop.f32.mrf.mxu3 }
 0x828   : > { %v2299_v26 = vmul.f32 %v2261_v22, %v2192_v21 }
 0x82a   : > { %2307 = vrot.lane.b32.xlu0 %v2299_v26, %s3592_s2 }
 0x82f   : > { %v2264_v23 = vpop.f32.mrf.mxu3 }
 0x83b   : > { %v4287_v27 = vpop.xlane.xlu1 %1925 }
 0x83e   : > { %v2511_v7 = vpop.f32.mrf.mxu3 }
 0x83f   : > { %v4295_v30 = vpop.xlane.xlu2 %2177 }
 0x843   : > { %v2172_v29 = vpop.xlane.xlu1 %2171 }
 0x844   : > { %3200 = vrcp.f32 %v2172_v29  ;;  %v2204_v41 = vand.u32 2147483648, %v2172_v29  ;;  %v2202_v44 = vand.u32 2147483647, %v2172_v29  ;;  %vm2198_vm9 = vweird.f32 %v2172_v29  ;;  %v4298_v46 = vpop.f32.mrf.mxu0 }
 0x846   : > { %v2205_v50 = vor.u32 1.1754944e-38, %v2204_v41  ;;  %vm2203_vm11 = vcmp.eq.f32.partialorder %v2202_v44, 8.507059e+37  ;;  %v1967_v41 = vor.u32 1.1754944e-38, %v1966_v16 }
 0x847   : > { %v4307_v62 = vpop.xlane.xlu2 %2424 }
 0x84a   : > { %v3201_v34 = vpop.eup %3200 }
 0x84b   : > { %v2194_v24 = vmul.f32 %v3201_v34, %v2172_v29  ;;  %v2175_v37 = vpop.xlane.xlu1 %2174  ;;  %vm2199_vm8 = vweird.f32 %v3201_v34 }
 0x84c   : > { %3202 = vrcp.f32 %v2175_v37  ;;  %vm2200_vm10 = vmor %vm2198_vm9, %vm2199_vm8  ;;  %v2218_v63 = vand.u32 2147483648, %v2175_v37  ;;  %v2216_v54 = vand.u32 2147483647, %v2175_v37  ;;  %vm2212_vm13 = vweird.f32 %v2175_v37  ;;  %v2293_v9 = vpop.f32.mrf.mxu0 }
 0x84d   : > { %3204 = vrcp.f32 %v4291_v33  ;;  %v2195_v39 = vsub.f32 1.0, %v2194_v24  ;;  %vm1960_vm8 = vweird.f32 %v4291_v33 }
 0x84e   : > { %v2219_v1 = vor.u32 1.1754944e-38, %v2218_v63  ;;  %vm2217_vm15 = vcmp.eq.f32.partialorder %v2216_v54, 8.507059e+37 }
 0x84f   : > { %v2196_v42 = vmul.f32 %v3201_v34, %v2195_v39 }
 0x851   : > { %v2197_v45 = vadd.f32 %v3201_v34, %v2196_v42 }
 0x852   : > { %v3203_v40 = vpop.eup %3202 }
 0x853   : > { %v4300_v47 = vpop.eup %3204  ;;  %v2208_v52 = vmul.f32 %v3203_v40, %v2175_v37  ;;  %v2419_v28 = vpop.xlane.xlu1 %2418  ;;  %v2201_v36 = vsel %vm2200_vm10, %v3201_v34, %v2197_v45  ;;  %vm2213_vm12 = vweird.f32 %v3203_v40  ;;  %v1964_v37 = vand.u32 2147483647, %v4291_v33 }
 0x854   : > { %3206 = vrcp.f32 %v2419_v28  ;;  %1697 = vadd.xlane.f32.xlu0 %v1696_v53  ;;  %v2206_v57 = vsel %vm2203_vm11, %v2205_v50, %v2201_v36  ;;  %v1956_v61 = vmul.f32 %v4300_v47, %v4291_v33  ;;  %vm2214_vm14 = vmor %vm2212_vm13, %vm2213_vm12  ;;  %v2440_v2 = vand.u32 2147483648, %v2419_v28 }
 0x855   : > { %v2209_v58 = vsub.f32 1.0, %v2208_v52  ;;  %v2300_v60 = vmul.f32 %v2264_v23, %v2206_v57  ;;  %3208 = vrcp.f32 %v4287_v27  ;;  %v2438_v15 = vand.u32 2147483647, %v2419_v28  ;;  %v4346_v23 = vpop.f32.mrf.mxu0 }
 0x856   : > { %3210 = vrcp.f32 %v4307_v62  ;;  %v1957_v0 = vsub.f32 1.0, %v1956_v61  ;;  %vm2434_vm3 = vweird.f32 %v2419_v28  ;;  %vm1961_vm4 = vweird.f32 %v4300_v47 }
 0x857   : > { %v2210_v59 = vmul.f32 %v3203_v40, %v2209_v58  ;;  %2309 = vrot.lane.b32.xlu1 %v2300_v60, %s3592_s2  ;;  %v2441_v26 = vor.u32 1.1754944e-38, %v2440_v2  ;;  %vm2439_vm9 = vcmp.eq.f32.partialorder %v2438_v15, 8.507059e+37  ;;  %vm4334_vm10 = vmor %vm1960_vm8, %vm1961_vm4  ;;  %vm1965_vm12 = vcmp.eq.f32.partialorder %v1964_v37, 8.507059e+37 }
 0x858   : > { %v1958_v12 = vmul.f32 %v4300_v47, %v1957_v0  ;;  %v2514_v0 = vpop.f32.mrf.mxu3  ;;  %vm2462_vm8 = vweird.f32 %v4307_v62 }
 0x859   : > { %v2211_v51 = vadd.f32 %v3203_v40, %v2210_v59 }
 0x85a   : > { %v3207_v6 = vpop.eup %3206  ;;  %v1959_v19 = vadd.f32 %v4300_v47, %v1958_v12  ;;  %v2468_v12 = vand.u32 2147483648, %v4307_v62 }
 0x85b   : > { %v2215_v3 = vsel %vm2214_vm14, %v3203_v40, %v2211_v51  ;;  %v2430_v4 = vmul.f32 %v3207_v6, %v2419_v28  ;;  %v4311_v48 = vpop.xlane.xlu1 %2421  ;;  %v4313_v49 = vpop.eup %3208  ;;  %vm2435_vm2 = vweird.f32 %v3207_v6 }
 0x85c   : > { %v2220_v8 = vsel %vm2217_vm15, %v2219_v1, %v2215_v3  ;;  %3212 = vrcp.f32 %v4311_v48  ;;  %v4317_v5 = vpop.eup %3210  ;;  %v1970_v55 = vmul.f32 %v4313_v49, %v4287_v27  ;;  %vm2436_vm5 = vmor %vm2434_vm3, %vm2435_vm2  ;;  %v1963_v45 = vsel %vm4334_vm10, %v4300_v47, %v1959_v19 }
 0x85d   : > { %v2301_v10 = vmul.f32 %v2293_v9, %v2220_v8  ;;  %v2431_v11 = vsub.f32 1.0, %v2430_v4  ;;  %3214 = vrcp.f32 %v4295_v30  ;;  %v2458_v21 = vmul.f32 %v4317_v5, %v4307_v62 }
 0x85e   : > { %v1971_v22 = vsub.f32 1.0, %v1970_v55  ;;  %v2454_v50 = vand.u32 2147483648, %v4311_v48  ;;  %v2452_v36 = vand.u32 2147483647, %v4311_v48  ;;  %v1968_v57 = vsel %vm1965_vm12, %v1967_v41, %v1963_v45  ;;  %v2587_v45 = vld [vmem:[#allocation16 + $0x10] sm:$0xff] }
 0x85f   : > { %v2432_v14 = vmul.f32 %v3207_v6, %v2431_v11  ;;  %2311 = vrot.lane.b32.xlu2 %v2301_v10, %s3592_s2  ;;  %v2459_v40 = vsub.f32 1.0, %v2458_v21  ;;  %vm2448_vm13 = vweird.f32 %v4311_v48  ;;  %vm1975_vm14 = vweird.f32 %v4313_v49 }
 0x860   : > { %v1972_v33 = vmul.f32 %v4313_v49, %v1971_v22  ;;  %v2455_v61 = vor.u32 1.1754944e-38, %v2454_v50  ;;  %vm2453_vm2 = vcmp.eq.f32.partialorder %v2452_v36, 8.507059e+37  ;;  %vm1974_vm3 = vweird.f32 %v4287_v27  ;;  %v2585_v50 = vld [vmem:[#allocation16] sm:$0xff] }
 0x861   : > { %v2433_v18 = vadd.f32 %v3207_v6, %v2432_v14  ;;  %v2460_v63 = vmul.f32 %v4317_v5, %v2459_v40  ;;  %v1978_v3 = vand.u32 2147483647, %v4287_v27  ;;  %v2051_v8 = vmul.f32 %v4293_v35, %v1968_v57  ;;  %vm1976_vm4 = vmor %vm1974_vm3, %vm1975_vm14  ;;  %v2586_v40 = vld [vmem:[#allocation16 + $0x8] sm:$0xff] }
 0x862   : > { %v3213_v17 = vpop.eup %3212  ;;  %v1973_v59 = vadd.f32 %v4313_v49, %v1972_v33  ;;  %v2466_v35 = vand.u32 2147483647, %v4307_v62  ;;  %v2469_v16 = vor.u32 1.1754944e-38, %v2468_v12 }
 0x863   : > { %v2444_v29 = vmul.f32 %v3213_v17, %v4311_v48  ;;  %v4329_v34 = vpop.xlane.xlu1 %2427  ;;  %v2437_v24 = vsel %vm2436_vm5, %v3207_v6, %v2433_v18  ;;  %v4342_v28 = vpop.eup %3214  ;;  %vm2449_vm11 = vweird.f32 %v3213_v17  ;;  %v1980_v6 = vand.u32 2147483648, %v4287_v27 }
 0x864   : > { %3216 = vrcp.f32 %v4329_v34  ;;  %v2442_v44 = vsel %vm2439_vm9, %v2441_v26, %v2437_v24  ;;  %v2222_v60 = vmul.f32 %v4342_v28, %v4295_v30  ;;  %vm2450_vm15 = vmor %vm2448_vm13, %vm2449_vm11  ;;  %v2461_v10 = vadd.f32 %v4317_v5, %v2460_v63 }
 0x865   : > { %v2445_v42 = vsub.f32 1.0, %v2444_v29  ;;  %v2549_v52 = vmul.f32 %v2511_v7, %v2442_v44  ;;  %vm2463_vm5 = vweird.f32 %v4317_v5  ;;  %v1977_v11 = vsel %vm1976_vm4, %v4313_v49, %v1973_v59  ;;  %v2543_v49 = vpop.f32.mrf.mxu0 }
 0x866   : > { %v2223_v9 = vsub.f32 1.0, %v2222_v60  ;;  %v1981_v27 = vor.u32 1.1754944e-38, %v1980_v6  ;;  %vm1979_vm9 = vcmp.eq.f32.partialorder %v1978_v3, 8.507059e+37  ;;  %vm2464_vm10 = vmor %vm2462_vm8, %vm2463_vm5  ;;  %vm2467_vm12 = vcmp.eq.f32.partialorder %v2466_v35, 8.507059e+37 }
 0x867   : > { %v2446_v53 = vmul.f32 %v3213_v17, %v2445_v42  ;;  %2557 = vrot.lane.b32.xlu1 %v2549_v52, %s3593_s16  ;;  %v2465_v15 = vsel %vm2464_vm10, %v4317_v5, %v2461_v10  ;;  %vm2476_vm13 = vweird.f32 %v4329_v34  ;;  %v2480_v62 = vand.u32 2147483647, %v4329_v34 }
 0x868   : > { %v1982_v14 = vsel %vm1979_vm9, %v1981_v27, %v1977_v11  ;;  %v2224_v2 = vmul.f32 %v4342_v28, %v2223_v9  ;;  %v2470_v7 = vsel %vm2467_vm12, %v2469_v16, %v2465_v15  ;;  %vm2227_vm14 = vweird.f32 %v4342_v28 }
 0x869   : > { %v2447_v47 = vadd.f32 %v3213_v17, %v2446_v53  ;;  %v2052_v19 = vmul.f32 %v4298_v46, %v1982_v14  ;;  %v2551_v22 = vmul.f32 %v2543_v49, %v2470_v7  ;;  %v2232_v5 = vand.u32 2147483648, %v4295_v30 }
 0x86a   : > { %v3217_v58 = vpop.eup %3216  ;;  %v2225_v21 = vadd.f32 %v4342_v28, %v2224_v2  ;;  %v2230_v46 = vand.u32 2147483647, %v4295_v30  ;;  %vm2481_vm4 = vcmp.eq.f32.partialorder %v2480_v62, 8.507059e+37 }
 0x86b   : > { %v2472_v54 = vmul.f32 %v3217_v58, %v4329_v34  ;;  %v2451_v51 = vsel %vm2450_vm15, %v3213_v17, %v2447_v47  ;;  %vm2477_vm11 = vweird.f32 %v3217_v58  ;;  %v2482_v17 = vand.u32 2147483648, %v4329_v34 }
 0x86c   : > { %v2456_v1 = vsel %vm2453_vm2, %v2455_v61, %v2451_v51  ;;  %vm2478_vm15 = vmor %vm2476_vm13, %vm2477_vm11  ;;  %vm2226_vm2 = vweird.f32 %v4295_v30  ;;  %v2233_v37 = vor.u32 1.1754944e-38, %v2232_v5  ;;  %vm2231_vm5 = vcmp.eq.f32.partialorder %v2230_v46, 8.507059e+37  ;;  %v2588_v30 = vld [vmem:[#allocation16 + $0x18] sm:$0xff] }
 0x86d   : > { %v2473_v4 = vsub.f32 1.0, %v2472_v54  ;;  %v2550_v48 = vmul.f32 %v2514_v0, %v2456_v1  ;;  %v2483_v29 = vor.u32 1.1754944e-38, %v2482_v17  ;;  %vm2228_vm3 = vmor %vm2226_vm2, %vm2227_vm14  ;;  %v2546_v39 = vpop.f32.mrf.mxu0  ;;  %2617 = vmatpush.msrb.mxu1 %v2588_v30  ;;  %v1817_v61 = vadd.f32 %v4276_v32, %v4080_v43 }
 0x86e   : > { %v2229_v34 = vsel %vm2228_vm3, %v4342_v28, %v2225_v21  ;;  %v1818_v32 = vadd.f32 %v4282_v56, %v4084_v25 }
 0x86f   : > { %v2474_v55 = vmul.f32 %v3217_v58, %v2473_v4  ;;  %2559 = vrot.lane.b32.xlu2 %v2550_v48, %s3593_s16  ;;  %2061 = vrot.lane.b32.xlu1 %v2051_v8, %s3591_s25  ;;  %v2234_v41 = vsel %vm2231_vm5, %v2233_v37, %v2229_v34  ;;  %v3123_v34 = vld [vmem:[%s4519_s18] ss:$0 sm:$0xff] }
 0x870   : > { %v2302_v44 = vmul.f32 %v4346_v23, %v2234_v41  ;;  %2618 = vmatpush.msrb.mxu1 %v2587_v45 }
 0x871   : > { %v2475_v18 = vadd.f32 %v3217_v58, %v2474_v55 }
 0x872   : > { %2619 = vmatpush.msrb.mxu1 %v2586_v40 }
 0x873   : > { %v2479_v26 = vsel %vm2478_vm15, %v3217_v58, %v2475_v18 }
 0x874   : > { %v2484_v24 = vsel %vm2481_vm4, %v2483_v29, %v2479_v26  ;;  %2620 = vmatpush.msrb.mxu1 %v2585_v50  ;;  %v2058_v28 = vpop.permute.xlu2 %2057 }
 0x875   : > { %v2552_v42 = vmul.f32 %v2546_v39, %v2484_v24  ;;  %v2069_v58 = vadd.f32 %v2058_v28, %v4080_v43 }
 0x877   : > { %2063 = vrot.lane.b32.xlu2 %v2052_v19, %s3591_s25  ;;  %2561 = vrot.lane.b32.xlu1 %v2551_v22, %s3593_s16  ;;  %v2573_v54 = vsel %vm763_vm1, %v1817_v61, %v2069_v58 }
 0x87c   : > { %v2060_v53 = vpop.permute.xlu2 %2059 }
 0x87d   : > { %v2070_v0 = vadd.f32 %v2060_v53, %v4084_v25 }
 0x87f   : > { %2563 = vrot.lane.b32.xlu2 %v2552_v42, %s3593_s16  ;;  %2313 = vrot.lane.b32.xlu1 %v2302_v44, %s3592_s2  ;;  %v2574_v8 = vsel %vm763_vm1, %v1818_v32, %v2070_v0  ;;  %s672_s2 = scalar_lea.vmem [#allocation17], %s3852_s6  ;;  %s2943_s16 = sshll.u32 %s3704_s28, 5 }
 0x880   : > { %s2659_s6 = scalar_lea.hbm %s4520_s29, %s2943_s16  ;;  %s2660_s20 = sshll.u32 %s672_s2, 4  ;;  %s2661_s20 = int_to_ptr.vmem [resolvable:$true] %s2660_s20 }
 0x881   : > { %s2662_s19 = sshll.u32 %s2659_s6, 4  ;;  %s2663_s19 = int_to_ptr.hbm [resolvable:$true] %s2662_s19 }
 0x882   : > { %s3504_s28 = sshra.s32 %s2663_s19, 4  ;;  %s3505_s28 = int_to_ptr.hbm [resolvable:$true] %s3504_s28 }
 0x883   : > { %s3506_s30 = scalar_lea.hbm %s3505_s28, 32  ;;  %p3511_p11 = scmp.lt.s32.totalorder %s3505_s28, %s4520_s29 }
 0x884   : > { %p3507_p1 = scmp.ne.s32.totalorder %s3505_s28, %s3506_s30  ;;  %p3512_p7 = scmp.lt.s32.totalorder %s3510_s15, %s3506_s30 }
 0x886   : > { %p3508_p3 = pnand %p3507_p1, %p3807_p4  ;;  %p3513_p8 = por %p3512_p7, %p3511_p11 }
 0x888   : > { %p3509_p5 = pneg %p3508_p3 }
 0x88a   : > { %p3514_p9 = pnand %p3513_p8, %p3509_p5 }
 0x89c   : > { %v2308_v52 = vpop.permute.xlu0 %2307 }
 0x89d   : > { %v2319_v60 = vadd.f32 %v2308_v52, %v4080_v43 }
 0x89f   : > { %v2577_v6 = vsel %vm685_vm0, %v2573_v54, %v2319_v60 }
 0x8b9   : > { %v2312_v23 = vpop.permute.xlu2 %2311 }
 0x8ba   : > { %v2321_v16 = vadd.f32 %v2312_v23, %v4091_v31 }
 0x8c7   : > { %v1698_v33 = vpop.xlane.xlu0 %1697 }
 0x8c8   : > { %3218 = vrcp.f32 %v1698_v33  ;;  %v1752_v12 = vand.u32 2147483648, %v1698_v33  ;;  %vm1746_vm9 = vweird.f32 %v1698_v33  ;;  %v1750_v55 = vand.u32 2147483647, %v1698_v33 }
 0x8c9   : > { %v2310_v36 = vpop.permute.xlu1 %2309  ;;  %v2560_v1 = vpop.permute.xlu2 %2559 }
 0x8ca   : > { %v2320_v48 = vadd.f32 %v2310_v36, %v4084_v25  ;;  %v2570_v9 = vadd.f32 %v2560_v1, %v4084_v25  ;;  %v1753_v56 = vor.u32 1.1754944e-38, %v1752_v12  ;;  %v1819_v25 = vadd.f32 %v4274_v13, %v4091_v31 }
 0x8cb   : > { %vm1751_vm11 = vcmp.eq.f32.partialorder %v1750_v55, 8.507059e+37 }
 0x8cc   : > { %v2578_v11 = vsel %vm685_vm0, %v2574_v8, %v2320_v48 }
 0x8cd   : > { %v2582_v35 = vsel %vm1451_vm6, %v2578_v11, %v2570_v9 }
 0x8ce   : > { %v3219_v57 = vpop.eup %3218 }
 0x8cf   : > { %v1742_v47 = vmul.f32 %v3219_v57, %v1698_v33  ;;  %vm1747_vm8 = vweird.f32 %v3219_v57 }
 0x8d0   : > { %vm1748_vm10 = vmor %vm1746_vm9, %vm1747_vm8 }
 0x8d1   : > { %v1743_v63 = vsub.f32 1.0, %v1742_v47  ;;  %v2064_v2 = vpop.permute.xlu2 %2063 }
 0x8d2   : > { %v2072_v22 = vadd.f32 %v2064_v2, %v4105_v38 }
 0x8d3   : > { %v1744_v4 = vmul.f32 %v3219_v57, %v1743_v63 }
 0x8d9   : > { %v2558_v59 = vpop.permute.xlu1 %2557  ;;  %v2564_v21 = vpop.permute.xlu2 %2563 }
 0x8da   : > { %v2569_v51 = vadd.f32 %v2558_v59, %v4080_v43  ;;  %v1745_v43 = vadd.f32 %v3219_v57, %v1744_v4 }
 0x8dc   : > { %v2581_v3 = vsel %vm1451_vm6, %v2577_v6, %v2569_v51  ;;  %v1749_v14 = vsel %vm1748_vm10, %v3219_v57, %v1745_v43 }
 0x8dd   : > { %2930 = vmatmul.msk.f32.vlgmr.msrb.gmra.mxu1 %vm1462_vm7, %v2581_v3  ;;  %v1754_v15 = vsel %vm1751_vm11, %v1753_v56, %v1749_v14 }
 0x8de   : > { %v1816_v19 = vmul.f32 %v4289_v20, %v1754_v15 }
 0x8e0   : > { %v1820_v13 = vadd.f32 %v1816_v19, %v4105_v38 }
 0x8e1   : > { %v2062_v10 = vpop.permute.xlu1 %2061 }
 0x8e2   : > { %v2071_v27 = vadd.f32 %v2062_v10, %v4091_v31  ;;  %v2576_v46 = vsel %vm763_vm1, %v1820_v13, %v2072_v22 }
 0x8e4   : > { %v2575_v49 = vsel %vm763_vm1, %v1819_v25, %v2071_v27 }
 0x8e5   : > { %2931 = vmatmul.msk.f32.gmra.mxu1 %vm1462_vm7, %v2582_v35  ;;  %v2579_v7 = vsel %vm685_vm0, %v2575_v49, %v2321_v16 }
 0x8e9   : > { %v2562_v18 = vpop.permute.xlu1 %2561 }
 0x8ea   : > { %v2571_v17 = vadd.f32 %v2562_v18, %v4091_v31  ;;  %v2572_v31 = vadd.f32 %v2564_v21, %v4105_v38 }
 0x8ec   : > { %v2583_v62 = vsel %vm1451_vm6, %v2579_v7, %v2571_v17 }
 0x8ed   : > { %2932 = vmatmul.msk.f32.gmra.mxu1 %vm1462_vm7, %v2583_v62 }
 0x8f1   : > { %v2314_v5 = vpop.permute.xlu1 %2313 }
 0x8f2   : > { %v2322_v26 = vadd.f32 %v2314_v5, %v4105_v38 }
 0x8f4   : > { %v2580_v20 = vsel %vm685_vm0, %v2576_v46, %v2322_v26 }
 0x8f5   : > { %v2584_v29 = vsel %vm1451_vm6, %v2580_v20, %v2572_v31 }
 0x8f6   : > { %2933 = vmatmul.msk.f32.gmra.mxu1 %vm1462_vm7, %v2584_v29 }
 0x95a   : > { %v2622_v24 = vpop.f32.mrf.mxu1 }
 0x95b   : > { %v2623_v37 = vadd.f32 %v3123_v34, %v2622_v24 }
 0x95d   : > { %v2634_v39 = vmax.f32 %v2623_v37, 0.0 }
 0x95f   : > { %v2638_v41 = vadd.f32 %v2634_v39, %v2581_v3 }
 0x961   : > { %2642 = vst.msk [vmem:[%s672_s2] sm:$0xff] %vm1462_vm7, %v2638_v41 }
 0x962   : > { %v2625_v42 = vpop.f32.mrf.mxu1 }
 0x963   : > { %v2626_v38 = vadd.f32 %v3123_v34, %v2625_v42 }
 0x965   : > { %v2635_v44 = vmax.f32 %v2626_v38, 0.0 }
 0x967   : > { %v2639_v30 = vadd.f32 %v2635_v44, %v2582_v35 }
 0x969   : > { %2643 = vst.msk [vmem:[%s672_s2 + $0x8] sm:$0xff] %vm1462_vm7, %v2639_v30 }
 0x96a   : > { %v2628_v45 = vpop.f32.mrf.mxu1 }
 0x96b   : > { %v2629_v40 = vadd.f32 %v3123_v34, %v2628_v45 }
 0x96d   : > { %v2636_v50 = vmax.f32 %v2629_v40, 0.0 }
 0x96f   : > { %v2640_v52 = vadd.f32 %v2636_v50, %v2583_v62 }
 0x971   : > { %2644 = vst.msk [vmem:[%s672_s2 + $0x10] sm:$0xff] %vm1462_vm7, %v2640_v52 }
 0x973   : > { %v2631_v28 = vpop.f32.mrf.mxu1 }
 0x974   : > { %v2632_v33 = vadd.f32 %v3123_v34, %v2631_v28 }
 0x976   : > { %v2637_v53 = vmax.f32 %v2632_v33, 0.0 }
 0x978   : > { %v2641_v36 = vadd.f32 %v2637_v53, %v2584_v29 }
 0x97a   : > { %2645 = vst.msk [vmem:[%s672_s2 + $0x18] sm:$0xff] %vm1462_vm7, %v2641_v36 }
 0x97b   : > { %3517 = shalt.err (!%p3514_p9)
}
 0x97c   : > { %s3594_s8 = smov 128  }
 0x97d   : > { %2980 = dma.vmem_to_hbm [thread:$0]  (%p3807_p4), %s2661_s20, 512, %s2663_s19, %s2647_s17, %s3594_s8, %s3594_s8, %s3591_s25  }
 0x97e PF: > { %s2677_s2 = sand.u32 1, %s3564_s21   ;;  %p4521_p10 = scmp.ge.s32.totalorder %s3576_s24, 2 }
 0x97f   : > { %s2678_s10 = scalar_lea.sflag [#allocation4], %s2677_s2 }
 0x980   : > { %p3012_p12 = pnand %p4521_p10, %p3811_p6 }
 0x982   : > { %p3013_p13 = pneg %p3012_p12 }
 0x984   : > { %3559 = dma.done.wait (%p3013_p13), %s2678_s10, 512  }
 0x985   : > { %3561 = vsyncadd (%p3013_p13), %s2678_s10, 4294966784  ;;  %p33_p0 = scmp.ge.s32.totalorder %s3782_s4, 4   ;;  %s4522_s21 = smov %s3568_s22 }
 0x986   : > { %s4523_s22 = smov %s3572_s23  ;;  %s4524_s23 = smov %s3793_s26 }
 0x987   : > { %s4525_s24 = smov %s3782_s4  ;;  %35 = sbr.rel (!%p33_p0) target bundleno = 21 (0x15), region = 162 }
 0x98c   :  { %2684 = vsyncpa [#allocation3], 1 }
 0x98d   :  { %2686 = vsyncpa [#allocation3 + $0x1], 1 }
 0x98e   :  { %2687 = vsyncpa [#allocation6], 1 }
 0x98f   :  { %2689 = vsyncpa [#allocation6 + $0x1], 1 }
 0x990   :  { %2690 = vsyncpa [#allocation9], 1 }
 0x991   :  { %2691 = vsyncpa [#allocation12], 1 }
 0x992   :  { %2692 = vsyncpa [#allocation15], 1 }
 0x993   :  { %2693 = vsyncpa [#allocation4], 1 }
 0x994   :  { %2695 = vsyncpa [#allocation4 + $0x1], 1 }

</bundles_post_ra>
